<compile_context>
chip_gen: v7x
topology: tpu7x:2x2x1
jax: 0.10.0
libtpu: 0.0.40
codegen_flags: <defaults>
</compile_context>

<pallas_src>
import functools

import jax
import jax.numpy as jnp
from jax.experimental import pallas as pl
from jax.experimental.pallas import tpu as pltpu


def _emg_mlp_kernel(x_ref, w1_ref, b1_ref, w2_ref, b2_ref,
                    w3_ref, b3_ref, w4_ref, b4_ref, o_ref,
                    *, use_softmax: bool):
    # Matmul-input dtype (f32 or bf16); biases / accumulation / elementwise are f32.
    cdt = w1_ref.dtype

    x = x_ref[...]

    h = jnp.dot(x, w1_ref[...], preferred_element_type=jnp.float32) + b1_ref[...]
    h = jnp.maximum(h, 0.0)

    h = jnp.dot(h.astype(cdt), w2_ref[...],
                preferred_element_type=jnp.float32) + b2_ref[...]
    h = jnp.maximum(h, 0.0)

    h = jnp.dot(h.astype(cdt), w3_ref[...],
                preferred_element_type=jnp.float32) + b3_ref[...]
    h = jnp.maximum(h, 0.0)

    logits = jnp.dot(h.astype(cdt), w4_ref[...],
                     preferred_element_type=jnp.float32) + b4_ref[...]

    if use_softmax:
        # softmax over the class dimension (padded classes carry a -1e30 bias,
        # so exp() of them is 0 and they don't affect the denominator).
        m = jnp.max(logits, axis=-1, keepdims=True)
        e = jnp.exp(logits - m)
        denom = jnp.sum(e, axis=-1, keepdims=True)
        logits = e * pl.reciprocal(denom, approx=True)

    o_ref[...] = logits.astype(o_ref.dtype)


def emg_model_forward(x, params, use_softmax: bool = False, *,
                      tile_b: int = 128, matmul_dtype=jnp.float32):
    """x: [B, num_features] f32.  params: (in,out) weights, (1,out) biases (f32)."""
    B, F = x.shape
    num_classes = params["w4"].shape[1]

    cdt = jnp.dtype(matmul_dtype)

    # --- pad batch to a multiple of the tile, classes to a multiple of 128 ---
    B_pad = pl.cdiv(B, tile_b) * tile_b
    C_pad = pl.cdiv(num_classes, 128) * 128

    x_p = x if B_pad == B else jnp.pad(x, ((0, B_pad - B), (0, 0)))
    x_p = x_p.astype(cdt)

    w1 = params["w1"].astype(cdt)
    w2 = params["w2"].astype(cdt)
    w3 = params["w3"].astype(cdt)
    b1 = params["b1"].astype(jnp.float32)
    b2 = params["b2"].astype(jnp.float32)
    b3 = params["b3"].astype(jnp.float32)

    w4 = params["w4"]
    b4 = params["b4"]
    if C_pad != num_classes:
        pad_c = C_pad - num_classes
        w4 = jnp.pad(w4, ((0, 0), (0, pad_c)))
        # Padded classes must not contribute to the softmax denominator.
        pad_val = -1e30 if use_softmax else 0.0
        b4 = jnp.pad(b4, ((0, 0), (0, pad_c)), constant_values=pad_val)
    w4 = w4.astype(cdt)
    b4 = b4.astype(jnp.float32)

    args = (x_p, w1, b1, w2, b2, w3, b3, w4, b4)

    # x tiled over the batch grid; weights/biases resident (constant index_map).
    resident = lambda a: pl.BlockSpec(a.shape, lambda i: (0, 0))
    in_specs = [pl.BlockSpec((tile_b, F), lambda i: (i, 0))] + \
               [resident(a) for a in args[1:]]
    out_specs = pl.BlockSpec((tile_b, C_pad), lambda i: (i, 0))

    kernel = functools.partial(_emg_mlp_kernel, use_softmax=use_softmax)

    out = pl.pallas_call(
        kernel,
        out_shape=jax.ShapeDtypeStruct((B_pad, C_pad), jnp.float32),
        grid=(B_pad // tile_b,),
        in_specs=in_specs,
        out_specs=out_specs,
        compiler_params=pltpu.CompilerParams(
            dimension_semantics=("parallel",)),
    )(*args)

    return out[:B, :num_classes]


def init_params(key, num_features=192, num_classes=100):
    """Deterministic synthetic init; weights stored as (in, out), biases as (1, out)."""
    dims = [(num_features, 256), (256, 256), (256, 128), (128, num_classes)]
    params = {}
    for i, (fan_in, fan_out) in enumerate(dims, start=1):
        key, kw, kb = jax.random.split(key, 3)
        bound = 1.0 / jnp.sqrt(fan_in)
        params[f"w{i}"] = jax.random.uniform(
            kw, (fan_in, fan_out), jnp.float32, -bound, bound)
        params[f"b{i}"] = jax.random.uniform(
            kb, (1, fan_out), jnp.float32, -bound, bound)
    return params


def reference_forward(x, params, use_softmax: bool = False):
    h = jnp.maximum(x @ params["w1"] + params["b1"], 0.0)
    h = jnp.maximum(h @ params["w2"] + params["b2"], 0.0)
    h = jnp.maximum(h @ params["w3"] + params["b3"], 0.0)
    logits = h @ params["w4"] + params["b4"]
    if use_softmax:
        logits = jax.nn.softmax(logits, axis=1)
    return logits


if __name__ == "__main__":
    key = jax.random.PRNGKey(0)
    k_param, k_x = jax.random.split(key)

    num_features, num_classes, batch = 192, 100, 8
    params = init_params(k_param, num_features, num_classes)
    x = jax.random.normal(k_x, (batch, num_features), jnp.float32)

    ref = reference_forward(x, params, use_softmax=False)
    ref_sm = reference_forward(x, params, use_softmax=True)

    # Default f32 path (faithful to the PyTorch module numerics).
    out = jax.block_until_ready(emg_model_forward(x, params, use_softmax=False))
    out_sm = jax.block_until_ready(emg_model_forward(x, params, use_softmax=True))

    assert out.shape == (batch, num_classes)
    assert out_sm.shape == (batch, num_classes)
    assert jnp.allclose(out, ref, atol=1e-4, rtol=1e-4)
    # approx reciprocal in the softmax denominator -> slightly looser tolerance
    assert jnp.allclose(out_sm, ref_sm, atol=1e-5, rtol=2e-3)

    # Opt-in bf16 matmul fast path (f32 accumulation) -> loose tolerance check.
    out_bf16 = jax.block_until_ready(
        emg_model_forward(x, params, use_softmax=False,
                          matmul_dtype=jnp.bfloat16))
    assert out_bf16.shape == (batch, num_classes)
    assert jnp.allclose(out_bf16, ref, atol=3e-2, rtol=3e-2)

    print("KERNEL_OK")
</pallas_src>

<mosaic_0001>
module attributes {stable_mosaic.version = 11 : i64} {
  func.func @_emg_mlp_kernel(%arg0: i32, %arg1: memref<128x192xf32, #tpu.memory_space<vmem>>, %arg2: memref<192x256xf32, #tpu.memory_space<vmem>>, %arg3: memref<1x256xf32, #tpu.memory_space<vmem>>, %arg4: memref<256x256xf32, #tpu.memory_space<vmem>>, %arg5: memref<1x256xf32, #tpu.memory_space<vmem>>, %arg6: memref<256x128xf32, #tpu.memory_space<vmem>>, %arg7: memref<1x128xf32, #tpu.memory_space<vmem>>, %arg8: memref<128x128xf32, #tpu.memory_space<vmem>>, %arg9: memref<1x128xf32, #tpu.memory_space<vmem>>, %arg10: memref<128x128xf32, #tpu.memory_space<vmem>>) attributes {dimension_semantics = [#tpu.dimension_semantics<parallel>], iteration_bounds = array<i64: 1>, scalar_prefetch = 0 : i64, scratch_operands = 0 : i64, tpu.core_type = #tpu.core_type<tc>, window_params = [{transform_indices = @transform_0, window_bounds = array<i64: 128, 192>}, {pipeline_mode = #tpu.pipeline_mode<synchronous>, transform_indices = @transform_1, window_bounds = array<i64: 192, 256>}, {pipeline_mode = #tpu.pipeline_mode<synchronous>, transform_indices = @transform_2, window_bounds = array<i64: 1, 256>}, {pipeline_mode = #tpu.pipeline_mode<synchronous>, transform_indices = @transform_3, window_bounds = array<i64: 256, 256>}, {pipeline_mode = #tpu.pipeline_mode<synchronous>, transform_indices = @transform_4, window_bounds = array<i64: 1, 256>}, {pipeline_mode = #tpu.pipeline_mode<synchronous>, transform_indices = @transform_5, window_bounds = array<i64: 256, 128>}, {pipeline_mode = #tpu.pipeline_mode<synchronous>, transform_indices = @transform_6, window_bounds = array<i64: 1, 128>}, {pipeline_mode = #tpu.pipeline_mode<synchronous>, transform_indices = @transform_7, window_bounds = array<i64: 128, 128>}, {pipeline_mode = #tpu.pipeline_mode<synchronous>, transform_indices = @transform_8, window_bounds = array<i64: 1, 128>}, {transform_indices = @transform_9, window_bounds = array<i64: 128, 128>}]} {
    %c0 = arith.constant 0 : index
    %c0_0 = arith.constant 0 : index
    %0 = vector.load %arg1[%c0, %c0_0] : memref<128x192xf32, #tpu.memory_space<vmem>>, vector<128x192xf32>
    %c0_1 = arith.constant 0 : index
    %c0_2 = arith.constant 0 : index
    %1 = vector.load %arg2[%c0_1, %c0_2] : memref<192x256xf32, #tpu.memory_space<vmem>>, vector<192x256xf32>
    %cst = arith.constant dense<0.000000e+00> : vector<128x256xf32>
    %2 = tpu.matmul %0, %1, %cst {dimension_numbers = #tpu.dot_dimension_numbers<[1], [0], [0], [1], [0, 0, 1, 1], [], []>} : vector<128x192xf32>, vector<192x256xf32>, vector<128x256xf32> -> vector<128x256xf32>
    %c0_3 = arith.constant 0 : index
    %c0_4 = arith.constant 0 : index
    %3 = vector.load %arg3[%c0_3, %c0_4] : memref<1x256xf32, #tpu.memory_space<vmem>>, vector<1x256xf32>
    %4 = vector.broadcast %3 : vector<1x256xf32> to vector<128x256xf32>
    %5 = arith.addf %2, %4 : vector<128x256xf32>
    %cst_5 = arith.constant 0.000000e+00 : f32
    %6 = vector.broadcast %cst_5 : f32 to vector<128x256xf32>
    %7 = arith.maximumf %5, %6 : vector<128x256xf32>
    %c0_6 = arith.constant 0 : index
    %c0_7 = arith.constant 0 : index
    %8 = vector.load %arg4[%c0_6, %c0_7] : memref<256x256xf32, #tpu.memory_space<vmem>>, vector<256x256xf32>
    %cst_8 = arith.constant dense<0.000000e+00> : vector<128x256xf32>
    %9 = tpu.matmul %7, %8, %cst_8 {dimension_numbers = #tpu.dot_dimension_numbers<[1], [0], [0], [1], [0, 0, 1, 1], [], []>} : vector<128x256xf32>, vector<256x256xf32>, vector<128x256xf32> -> vector<128x256xf32>
    %c0_9 = arith.constant 0 : index
    %c0_10 = arith.constant 0 : index
    %10 = vector.load %arg5[%c0_9, %c0_10] : memref<1x256xf32, #tpu.memory_space<vmem>>, vector<1x256xf32>
    %11 = vector.broadcast %10 : vector<1x256xf32> to vector<128x256xf32>
    %12 = arith.addf %9, %11 : vector<128x256xf32>
    %cst_11 = arith.constant 0.000000e+00 : f32
    %13 = vector.broadcast %cst_11 : f32 to vector<128x256xf32>
    %14 = arith.maximumf %12, %13 : vector<128x256xf32>
    %c0_12 = arith.constant 0 : index
    %c0_13 = arith.constant 0 : index
    %15 = vector.load %arg6[%c0_12, %c0_13] : memref<256x128xf32, #tpu.memory_space<vmem>>, vector<256x128xf32>
    %cst_14 = arith.constant dense<0.000000e+00> : vector<128x128xf32>
    %16 = tpu.matmul %14, %15, %cst_14 {dimension_numbers = #tpu.dot_dimension_numbers<[1], [0], [0], [1], [0, 0, 1, 1], [], []>} : vector<128x256xf32>, vector<256x128xf32>, vector<128x128xf32> -> vector<128x128xf32>
    %c0_15 = arith.constant 0 : index
    %c0_16 = arith.constant 0 : index
    %17 = vector.load %arg7[%c0_15, %c0_16] : memref<1x128xf32, #tpu.memory_space<vmem>>, vector<1x128xf32>
    %18 = vector.broadcast %17 : vector<1x128xf32> to vector<128x128xf32>
    %19 = arith.addf %16, %18 : vector<128x128xf32>
    %cst_17 = arith.constant 0.000000e+00 : f32
    %20 = vector.broadcast %cst_17 : f32 to vector<128x128xf32>
    %21 = arith.maximumf %19, %20 : vector<128x128xf32>
    %c0_18 = arith.constant 0 : index
    %c0_19 = arith.constant 0 : index
    %22 = vector.load %arg8[%c0_18, %c0_19] : memref<128x128xf32, #tpu.memory_space<vmem>>, vector<128x128xf32>
    %cst_20 = arith.constant dense<0.000000e+00> : vector<128x128xf32>
    %23 = tpu.matmul %21, %22, %cst_20 {dimension_numbers = #tpu.dot_dimension_numbers<[1], [0], [0], [1], [0, 0, 1, 1], [], []>} : vector<128x128xf32>, vector<128x128xf32>, vector<128x128xf32> -> vector<128x128xf32>
    %c0_21 = arith.constant 0 : index
    %c0_22 = arith.constant 0 : index
    %24 = vector.load %arg9[%c0_21, %c0_22] : memref<1x128xf32, #tpu.memory_space<vmem>>, vector<1x128xf32>
    %25 = vector.broadcast %24 : vector<1x128xf32> to vector<128x128xf32>
    %26 = arith.addf %23, %25 : vector<128x128xf32>
    %c0_23 = arith.constant 0 : index
    %c0_24 = arith.constant 0 : index
    %27 = vector.load %arg10[%c0_23, %c0_24] : memref<128x128xf32, #tpu.memory_space<vmem>>, vector<128x128xf32>
    tpu.vector_store %arg10[%c0_23, %c0_24], %26 {strides = array<i32>} : memref<128x128xf32, #tpu.memory_space<vmem>>, vector<128x128xf32>,
    return
  }
  func.func @transform_0(%arg0: i32) -> (i32, i32) {
    %c0_i32 = arith.constant 0 : i32
    %c0_i32_0 = arith.constant 0 : i32
    return %arg0, %c0_i32 : i32, i32
  }
  func.func @transform_1(%arg0: i32) -> (i32, i32) {
    %c0_i32 = arith.constant 0 : i32
    %c0_i32_0 = arith.constant 0 : i32
    %c0_i32_1 = arith.constant 0 : i32
    return %c0_i32, %c0_i32_0 : i32, i32
  }
  func.func @transform_2(%arg0: i32) -> (i32, i32) {
    %c0_i32 = arith.constant 0 : i32
    %c0_i32_0 = arith.constant 0 : i32
    %c0_i32_1 = arith.constant 0 : i32
    return %c0_i32, %c0_i32_0 : i32, i32
  }
  func.func @transform_3(%arg0: i32) -> (i32, i32) {
    %c0_i32 = arith.constant 0 : i32
    %c0_i32_0 = arith.constant 0 : i32
    %c0_i32_1 = arith.constant 0 : i32
    return %c0_i32, %c0_i32_0 : i32, i32
  }
  func.func @transform_4(%arg0: i32) -> (i32, i32) {
    %c0_i32 = arith.constant 0 : i32
    %c0_i32_0 = arith.constant 0 : i32
    %c0_i32_1 = arith.constant 0 : i32
    return %c0_i32, %c0_i32_0 : i32, i32
  }
  func.func @transform_5(%arg0: i32) -> (i32, i32) {
    %c0_i32 = arith.constant 0 : i32
    %c0_i32_0 = arith.constant 0 : i32
    %c0_i32_1 = arith.constant 0 : i32
    return %c0_i32, %c0_i32_0 : i32, i32
  }
  func.func @transform_6(%arg0: i32) -> (i32, i32) {
    %c0_i32 = arith.constant 0 : i32
    %c0_i32_0 = arith.constant 0 : i32
    %c0_i32_1 = arith.constant 0 : i32
    return %c0_i32, %c0_i32_0 : i32, i32
  }
  func.func @transform_7(%arg0: i32) -> (i32, i32) {
    %c0_i32 = arith.constant 0 : i32
    %c0_i32_0 = arith.constant 0 : i32
    %c0_i32_1 = arith.constant 0 : i32
    return %c0_i32, %c0_i32_0 : i32, i32
  }
  func.func @transform_8(%arg0: i32) -> (i32, i32) {
    %c0_i32 = arith.constant 0 : i32
    %c0_i32_0 = arith.constant 0 : i32
    %c0_i32_1 = arith.constant 0 : i32
    return %c0_i32, %c0_i32_0 : i32, i32
  }
  func.func @transform_9(%arg0: i32) -> (i32, i32) {
    %c0_i32 = arith.constant 0 : i32
    %c0_i32_0 = arith.constant 0 : i32
    return %arg0, %c0_i32 : i32, i32
  }
}

</mosaic_0001>

<bundles_post_ra>
// kernel: tpu_custom_call.1
= control target key start
LH: loop header
LB: loop body
LE: loop exit
PB: predicated region body
PF: predicated region fallthrough
CT: control target
= control target key end

     0   :  { %14 = vsyncpa [#allocation3], 0  ;;  %s2028_s0 = inlined_call_operand.vmem [shape: f32[128,192], index: 0, kind: input, shape index: {}]   ;;  %s2029_s1 = inlined_call_operand.vmem [shape: f32[192,256], index: 1, kind: input, shape index: {}]   ;;  %s2030_s2 = inlined_call_operand.vmem [shape: f32[1,256], index: 2, kind: input, shape index: {}]   ;;  %s2031_s3 = inlined_call_operand.hbm [shape: f32[256,256], index: 3, kind: input, shape index: {}]   ;;  %s2032_s4 = inlined_call_operand.vmem [shape: f32[1,256], index: 4, kind: input, shape index: {}]   ;;  %s2033_s5 = inlined_call_operand.hbm [shape: f32[256,128], index: 5, kind: input, shape index: {}]   ;;  %s2034_s6 = inlined_call_operand.vmem [shape: f32[1,128], index: 6, kind: input, shape index: {}]   ;;  %s2035_s7 = inlined_call_operand.hbm [shape: f32[128,128], index: 7, kind: input, shape index: {}]   ;;  %s2036_s8 = inlined_call_operand.vmem [shape: f32[1,128], index: 8, kind: input, shape index: {}]   ;;  %s2037_s9 = inlined_call_operand.hbm [shape: f32[128,128], index: 9, kind: output, shape index: {}]  }
   0x1   :  { %15 = vsyncpa [#allocation6], 0 }
   0x2   :  { %16 = vsyncpa [#allocation4], 0  ;;  %s1543_s30 = smov [#allocation5]   ;;  %s1449_s13 = scalar_lea.hbm %s2033_s5, 4096 }
   0x3   :  { %s42_s10 = sshll.u32 %s1543_s30, 4  ;;  %p1450_p0 = scmp.ne.s32.totalorder %s2033_s5, %s1449_s13  ;;  %s43_s10 = int_to_ptr.vmem [resolvable:$true] %s42_s10 }
   0x4   :  { %p1453_p1 = scmp.lt.u32.totalorder %s1449_s13, %s2033_s5 }
   0x6   :  { %p1455_p2 = pnand %p1453_p1, %p1450_p0 }
   0x8   :  { %1458 = shalt.err (!%p1455_p2)
}
   0x9   :  { %s1459_s18 = scalar_lea.vmem %s43_s10, 4096  ;;  %p1464_p4 = scmp.lt.s32.totalorder %s43_s10, %s43_s10 }
   0xa   :  { %p1460_p3 = scmp.ne.s32.totalorder %s43_s10, %s1459_s18  ;;  %p1465_p5 = scmp.lt.s32.totalorder %s1459_s18, %s1459_s18 }
   0xc   :  { %p1466_p6 = por %p1465_p5, %p1464_p4 }
   0xe   :  { %p1467_p7 = pnand %p1466_p6, %p1460_p3 }
  0x10   :  { %1470 = shalt.err (!%p1467_p7)
}
  0x11   :  { %s1544_s19 = smov 128   ;;  %s1545_s20 = smov 8  }
  0x12   :  { %48 = dma.hbm_to_vmem [thread:$0]  %s2033_s5, 4096, %s43_s10, [#allocation6], %s1544_s19, %s1544_s19, %s1545_s20  }
  0x13   :  { %s1546_s23 = smov [#allocation2]   ;;  %s1471_s27 = scalar_lea.hbm %s2031_s3, 8192 }
  0x14   :  { %s28_s24 = sshll.u32 %s1546_s23, 4  ;;  %p1472_p8 = scmp.ne.s32.totalorder %s2031_s3, %s1471_s27  ;;  %s29_s24 = int_to_ptr.vmem [resolvable:$true] %s28_s24 }
  0x15   :  { %p1475_p9 = scmp.lt.u32.totalorder %s1471_s27, %s2031_s3 }
  0x17   :  { %p1477_p10 = pnand %p1475_p9, %p1472_p8 }
  0x19   :  { %1480 = shalt.err (!%p1477_p10)
}
  0x1a   :  { %s1481_s12 = scalar_lea.vmem %s29_s24, 8192  ;;  %p1486_p12 = scmp.lt.s32.totalorder %s29_s24, %s29_s24 }
  0x1b   :  { %p1482_p11 = scmp.ne.s32.totalorder %s29_s24, %s1481_s12  ;;  %p1487_p13 = scmp.lt.s32.totalorder %s1481_s12, %s1481_s12 }
  0x1d   :  { %p1488_p0 = por %p1487_p13, %p1486_p12 }
  0x1f   :  { %p1489_p1 = pnand %p1488_p0, %p1482_p11 }
  0x21   :  { %1492 = shalt.err (!%p1489_p1)
}
  0x22   :  { %s1547_s5 = smov 256   ;;  %s1548_s10 = smov 16  }
  0x23   :  { %34 = dma.hbm_to_vmem [thread:$0]  %s2031_s3, 8192, %s29_s24, [#allocation3], %s1547_s5, %s1547_s5, %s1548_s10  }
  0x24   :  { %s1549_s15 = smov [#allocation7]   ;;  %s1493_s21 = scalar_lea.hbm %s2035_s7, 2048 }
  0x25   :  { %s56_s16 = sshll.u32 %s1549_s15, 4  ;;  %p1494_p2 = scmp.ne.s32.totalorder %s2035_s7, %s1493_s21  ;;  %s57_s16 = int_to_ptr.vmem [resolvable:$true] %s56_s16 }
  0x26   :  { %p1497_p3 = scmp.lt.u32.totalorder %s1493_s21, %s2035_s7 }
  0x28   :  { %p1499_p4 = pnand %p1497_p3, %p1494_p2 }
  0x2a   :  { %1502 = shalt.err (!%p1499_p4)
}
  0x2b   :  { %s1503_s27 = scalar_lea.vmem %s57_s16, 2048  ;;  %p1508_p6 = scmp.lt.s32.totalorder %s57_s16, %s57_s16 }
  0x2c   :  { %p1504_p5 = scmp.ne.s32.totalorder %s57_s16, %s1503_s27  ;;  %p1509_p7 = scmp.lt.s32.totalorder %s1503_s27, %s1503_s27 }
  0x2e   :  { %p1510_p8 = por %p1509_p7, %p1508_p6 }
  0x30   :  { %p1511_p9 = pnand %p1510_p8, %p1504_p5 }
  0x32   :  { %1514 = shalt.err (!%p1511_p9)
}
  0x33   :  { %62 = dma.hbm_to_vmem [thread:$0]  %s2035_s7, 2048, %s57_s16, [#allocation6], %s1544_s19, %s1544_s19, %s1545_s20  }
  0x34   :  { %1537 = dma.done.wait [#allocation3], 8192  }
  0x35   :  { %1538 = vsyncadd [#allocation3], 4294959104 }
  0x36   :  { %1539 = dma.done.wait [#allocation6], 6144  }
  0x37   :  { %1540 = vsyncadd [#allocation6], 4294961152  ;;  %v107_v0 = vld [vmem:[%s2029_s1 + $0x8] sm:$0xff]  ;;  %v109_v1 = vld [vmem:[%s2029_s1 + $0x18] sm:$0xff]  ;;  %vm166_vm0 = vcmask 523264  }
  0x38   :  { %v106_v2 = vld [vmem:[%s2029_s1] sm:$0xff]  ;;  %v1265_v3 = vpack.c.bf16 %v109_v1, %v107_v0  ;;  %v108_v4 = vld [vmem:[%s2029_s1 + $0x10] sm:$0xff]  ;;  %v111_v5 = vld [vmem:[%s2029_s1 + $0x28] sm:$0xff] }
  0x39   :  { %v113_v6 = vld [vmem:[%s2029_s1 + $0x38] sm:$0xff]  ;;  %v1267_v7 = vpack.c.bf16 %v108_v4, %v106_v2  ;;  %v110_v9 = vld [vmem:[%s2029_s1 + $0x20] sm:$0xff]  ;;  %v112_v10 = vld [vmem:[%s2029_s1 + $0x30] sm:$0xff] }
  0x3a   :  { %v1269_v8 = vpack.c.bf16 %v113_v6, %v111_v5  ;;  %v115_v11 = vld [vmem:[%s2029_s1 + $0x48] sm:$0xff]  ;;  %1266 = vmatprep.subr.bf16.mxu0 %v1265_v3  ;;  %v117_v12 = vld [vmem:[%s2029_s1 + $0x58] sm:$0xff]  ;;  %v1271_v13 = vpack.c.bf16 %v112_v10, %v110_v9  ;;  %v114_v15 = vld [vmem:[%s2029_s1 + $0x40] sm:$0xff] }
  0x3b   :  { %1268 = vmatpush1.bf16.msra.mxu0 %v1267_v7  ;;  %v1273_v14 = vpack.c.bf16 %v117_v12, %v115_v11  ;;  %v116_v16 = vld [vmem:[%s2029_s1 + $0x50] sm:$0xff]  ;;  %v119_v17 = vld [vmem:[%s2029_s1 + $0x68] sm:$0xff]  ;;  %v121_v18 = vld [vmem:[%s2029_s1 + $0x78] sm:$0xff] }
  0x3c   :  { %1270 = vmatprep.subr.bf16.mxu0 %v1269_v8  ;;  %v1275_v19 = vpack.c.bf16 %v116_v16, %v114_v15  ;;  %v1277_v20 = vpack.c.bf16 %v121_v18, %v119_v17  ;;  %v118_v21 = vld [vmem:[%s2029_s1 + $0x60] sm:$0xff]  ;;  %v120_v22 = vld [vmem:[%s2029_s1 + $0x70] sm:$0xff]  ;;  %v123_v23 = vld [vmem:[%s2029_s1 + $0x88] sm:$0xff] }
  0x3d   :  { %v125_v24 = vld [vmem:[%s2029_s1 + $0x98] sm:$0xff]  ;;  %v1279_v25 = vpack.c.bf16 %v120_v22, %v118_v21  ;;  %v122_v27 = vld [vmem:[%s2029_s1 + $0x80] sm:$0xff]  ;;  %v124_v28 = vld [vmem:[%s2029_s1 + $0x90] sm:$0xff] }
  0x3e   :  { %v1281_v26 = vpack.c.bf16 %v125_v24, %v123_v23  ;;  %v127_v29 = vld [vmem:[%s2029_s1 + $0xa8] sm:$0xff]  ;;  %v129_v30 = vld [vmem:[%s2029_s1 + $0xb8] sm:$0xff]  ;;  %v1283_v31 = vpack.c.bf16 %v124_v28, %v122_v27  ;;  %v126_v34 = vld [vmem:[%s2029_s1 + $0xa0] sm:$0xff] }
  0x3f   :  { %1272 = vmatpush1.bf16.msra.mxu0 %v1271_v13  ;;  %v75_v32 = vld [vmem:[%s2028_s0 + $0x8] sm:$0xff]  ;;  %v1285_v33 = vpack.c.bf16 %v129_v30, %v127_v29  ;;  %v128_v35 = vld [vmem:[%s2029_s1 + $0xb0] sm:$0xff]  ;;  %v133_v37 = vld [vmem:[%s2029_s1 + $0xd8] sm:$0xff] }
  0x40   :  { %1274 = vmatprep.subr.bf16.mxu0 %v1273_v14  ;;  %1079 = vmatprep.mubr.msk.f32.mxu0 %vm166_vm0, %v75_v32  ;;  %v131_v36 = vld [vmem:[%s2029_s1 + $0xc8] sm:$0xff]  ;;  %v1287_v38 = vpack.c.bf16 %v128_v35, %v126_v34  ;;  %v130_v40 = vld [vmem:[%s2029_s1 + $0xc0] sm:$0xff]  ;;  %v132_v41 = vld [vmem:[%s2029_s1 + $0xd0] sm:$0xff] }
  0x41   :  { %v1289_v39 = vpack.c.bf16 %v133_v37, %v131_v36  ;;  %v135_v42 = vld [vmem:[%s2029_s1 + $0xe8] sm:$0xff]  ;;  %v137_v43 = vld [vmem:[%s2029_s1 + $0xf8] sm:$0xff]  ;;  %v1291_v44 = vpack.c.bf16 %v132_v41, %v130_v40  ;;  %v134_v46 = vld [vmem:[%s2029_s1 + $0xe0] sm:$0xff] }
  0x42   :  { %v1293_v45 = vpack.c.bf16 %v137_v43, %v135_v42  ;;  %v136_v47 = vld [vmem:[%s2029_s1 + $0xf0] sm:$0xff]  ;;  %v139_v48 = vld [vmem:[%s2029_s1 + $0x108] sm:$0xff]  ;;  %v141_v49 = vld [vmem:[%s2029_s1 + $0x118] sm:$0xff] }
  0x43   :  { %1276 = vmatpush1.bf16.msra.mxu0 %v1275_v19  ;;  %v409_v50 = vld [vmem:[#allocation2 + $0x8] sm:$0xff]  ;;  %v138_v51 = vld [vmem:[%s2029_s1 + $0x100] sm:$0xff]  ;;  %v140_v52 = vld [vmem:[%s2029_s1 + $0x110] sm:$0xff]  ;;  %v1295_v56 = vpack.c.bf16 %v136_v47, %v134_v46  ;;  %v1297_v62 = vpack.c.bf16 %v141_v49, %v139_v48 }
  0x44   :  { %1278 = vmatprep.subr.bf16.mxu0 %v1277_v20  ;;  %v411_v53 = vld [vmem:[#allocation2 + $0x18] sm:$0xff]  ;;  %v408_v54 = vld [vmem:[#allocation2] sm:$0xff]  ;;  %v410_v55 = vld [vmem:[#allocation2 + $0x10] sm:$0xff]  ;;  %v1299_v6 = vpack.c.bf16 %v140_v52, %v138_v51 }
  0x45   :  { %v1313_v57 = vpack.c.bf16 %v411_v53, %v409_v50  ;;  %v1315_v58 = vpack.c.bf16 %v410_v55, %v408_v54  ;;  %v413_v59 = vld [vmem:[#allocation2 + $0x28] sm:$0xff]  ;;  %v415_v60 = vld [vmem:[#allocation2 + $0x38] sm:$0xff]  ;;  %v412_v61 = vld [vmem:[#allocation2 + $0x20] sm:$0xff] }
  0x46   :  { %v1317_v63 = vpack.c.bf16 %v415_v60, %v413_v59  ;;  %v414_v0 = vld [vmem:[#allocation2 + $0x30] sm:$0xff]  ;;  %v417_v1 = vld [vmem:[#allocation2 + $0x48] sm:$0xff]  ;;  %v419_v2 = vld [vmem:[#allocation2 + $0x58] sm:$0xff] }
  0x47   :  { %1280 = vmatpush1.bf16.msra.mxu0 %v1279_v25  ;;  %v143_v3 = vld [vmem:[%s2029_s1 + $0x128] sm:$0xff]  ;;  %v145_v4 = vld [vmem:[%s2029_s1 + $0x138] sm:$0xff]  ;;  %1314 = vmatprep.subr.bf16.mxu1 %v1313_v57  ;;  %v1319_v5 = vpack.c.bf16 %v414_v0, %v412_v61  ;;  %v142_v7 = vld [vmem:[%s2029_s1 + $0x120] sm:$0xff]  ;;  %v1321_v8 = vpack.c.bf16 %v419_v2, %v417_v1 }
  0x48   :  { %1282 = vmatprep.subr.bf16.mxu0 %v1281_v26  ;;  %1316 = vmatpush1.bf16.msra.mxu1 %v1315_v58  ;;  %v416_v9 = vld [vmem:[#allocation2 + $0x40] sm:$0xff]  ;;  %v418_v10 = vld [vmem:[#allocation2 + $0x50] sm:$0xff]  ;;  %v1301_v11 = vpack.c.bf16 %v145_v4, %v143_v3  ;;  %v421_v13 = vld [vmem:[#allocation2 + $0x68] sm:$0xff] }
  0x49   :  { %1318 = vmatprep.subr.bf16.mxu1 %v1317_v63  ;;  %v144_v12 = vld [vmem:[%s2029_s1 + $0x130] sm:$0xff]  ;;  %v423_v14 = vld [vmem:[#allocation2 + $0x78] sm:$0xff]  ;;  %v147_v15 = vld [vmem:[%s2029_s1 + $0x148] sm:$0xff]  ;;  %v1323_v17 = vpack.c.bf16 %v418_v10, %v416_v9 }
  0x4a   :  { %v149_v16 = vld [vmem:[%s2029_s1 + $0x158] sm:$0xff]  ;;  %v1303_v18 = vpack.c.bf16 %v144_v12, %v142_v7  ;;  %v146_v19 = vld [vmem:[%s2029_s1 + $0x140] sm:$0xff]  ;;  %v1325_v20 = vpack.c.bf16 %v423_v14, %v421_v13  ;;  %v422_v22 = vld [vmem:[#allocation2 + $0x70] sm:$0xff] }
  0x4b   :  { %1284 = vmatpush1.bf16.msra.mxu0 %v1283_v31  ;;  %v420_v21 = vld [vmem:[#allocation2 + $0x60] sm:$0xff]  ;;  %v1305_v23 = vpack.c.bf16 %v149_v16, %v147_v15  ;;  %v148_v24 = vld [vmem:[%s2029_s1 + $0x150] sm:$0xff]  ;;  %v425_v25 = vld [vmem:[#allocation2 + $0x88] sm:$0xff] }
  0x4c   :  { %1286 = vmatprep.subr.bf16.mxu0 %v1285_v33  ;;  %1320 = vmatpush1.bf16.msra.mxu1 %v1319_v5  ;;  %v427_v26 = vld [vmem:[#allocation2 + $0x98] sm:$0xff]  ;;  %v151_v27 = vld [vmem:[%s2029_s1 + $0x168] sm:$0xff]  ;;  %v1327_v29 = vpack.c.bf16 %v422_v22, %v420_v21  ;;  %v1307_v30 = vpack.c.bf16 %v148_v24, %v146_v19  ;;  %v150_v31 = vld [vmem:[%s2029_s1 + $0x160] sm:$0xff] }
  0x4d   :  { %1322 = vmatprep.subr.bf16.mxu1 %v1321_v8  ;;  %v153_v28 = vld [vmem:[%s2029_s1 + $0x178] sm:$0xff]  ;;  %v1329_v32 = vpack.c.bf16 %v427_v26, %v425_v25  ;;  %v424_v33 = vld [vmem:[#allocation2 + $0x80] sm:$0xff]  ;;  %v426_v34 = vld [vmem:[#allocation2 + $0x90] sm:$0xff] }
  0x4e   :  { %v1309_v35 = vpack.c.bf16 %v153_v28, %v151_v27  ;;  %v152_v36 = vld [vmem:[%s2029_s1 + $0x170] sm:$0xff]  ;;  %v429_v37 = vld [vmem:[#allocation2 + $0xa8] sm:$0xff]  ;;  %v428_v42 = vld [vmem:[#allocation2 + $0xa0] sm:$0xff] }
  0x4f   :  { %1288 = vmatpush1.bf16.msra.mxu0 %v1287_v38  ;;  %v431_v38 = vld [vmem:[#allocation2 + $0xb8] sm:$0xff]  ;;  %v1311_v40 = vpack.c.bf16 %v152_v36, %v150_v31  ;;  %v430_v43 = vld [vmem:[#allocation2 + $0xb0] sm:$0xff]  ;;  %v74_v47 = vld [vmem:[%s2028_s0] sm:$0xff] }
  0x50   :  { %1290 = vmatprep.subr.bf16.mxu0 %v1289_v39  ;;  %1324 = vmatpush1.bf16.msra.mxu1 %v1323_v17  ;;  %v1331_v39 = vpack.c.bf16 %v426_v34, %v424_v33  ;;  %v1333_v41 = vpack.c.bf16 %v431_v38, %v429_v37  ;;  %v1335_v46 = vpack.c.bf16 %v430_v43, %v428_v42  ;;  %v432_v49 = vld [vmem:[#allocation2 + $0xc0] sm:$0xff]  ;;  %v434_v50 = vld [vmem:[#allocation2 + $0xd0] sm:$0xff]  ;;  %v77_v51 = vld [vmem:[%s2028_s0 + $0x18] sm:$0xff] }
  0x51   :  { %1326 = vmatprep.subr.bf16.mxu1 %v1325_v20  ;;  %v437_v52 = vld [vmem:[#allocation2 + $0xe8] sm:$0xff]  ;;  %v439_v53 = vld [vmem:[#allocation2 + $0xf8] sm:$0xff]  ;;  %v1339_v54 = vpack.c.bf16 %v434_v50, %v432_v49  ;;  %v76_v55 = vld [vmem:[%s2028_s0 + $0x10] sm:$0xff] }
  0x52   :  { %v436_v57 = vld [vmem:[#allocation2 + $0xe0] sm:$0xff]  ;;  %v438_v58 = vld [vmem:[#allocation2 + $0xf0] sm:$0xff]  ;;  %v79_v59 = vld [vmem:[%s2028_s0 + $0x28] sm:$0xff] }
  0x53   :  { %1292 = vmatpush1.bf16.msra.mxu0 %v1291_v44  ;;  %v433_v44 = vld [vmem:[#allocation2 + $0xc8] sm:$0xff]  ;;  %v443_v61 = vld [vmem:[#allocation2 + $0x118] sm:$0xff]  ;;  %v78_v63 = vld [vmem:[%s2028_s0 + $0x20] sm:$0xff] }
  0x54   :  { %1294 = vmatprep.subr.bf16.mxu0 %v1293_v45  ;;  %1328 = vmatpush1.bf16.msra.mxu1 %v1327_v29  ;;  %v435_v45 = vld [vmem:[#allocation2 + $0xd8] sm:$0xff]  ;;  %v441_v60 = vld [vmem:[#allocation2 + $0x108] sm:$0xff]  ;;  %v440_v1 = vld [vmem:[#allocation2 + $0x100] sm:$0xff] }
  0x55   :  { %1330 = vmatprep.subr.bf16.mxu1 %v1329_v32  ;;  %v1337_v48 = vpack.c.bf16 %v435_v45, %v433_v44  ;;  %v1345_v0 = vpack.c.bf16 %v443_v61, %v441_v60  ;;  %v442_v2 = vld [vmem:[#allocation2 + $0x110] sm:$0xff]  ;;  %v81_v3 = vld [vmem:[%s2028_s0 + $0x38] sm:$0xff]  ;;  %v445_v4 = vld [vmem:[#allocation2 + $0x128] sm:$0xff] }
  0x56   :  { %v447_v5 = vld [vmem:[#allocation2 + $0x138] sm:$0xff]  ;;  %v80_v7 = vld [vmem:[%s2028_s0 + $0x30] sm:$0xff]  ;;  %v444_v9 = vld [vmem:[#allocation2 + $0x120] sm:$0xff] }
  0x57   :  { %1296 = vmatpush1.bf16.msra.mxu0 %v1295_v56  ;;  %v1341_v56 = vpack.c.bf16 %v439_v53, %v437_v52  ;;  %v1349_v8 = vpack.c.bf16 %v447_v5, %v445_v4  ;;  %v446_v10 = vld [vmem:[#allocation2 + $0x130] sm:$0xff]  ;;  %v449_v12 = vld [vmem:[#allocation2 + $0x148] sm:$0xff]  ;;  %v451_v13 = vld [vmem:[#allocation2 + $0x158] sm:$0xff] }
  0x58   :  { %1298 = vmatprep.subr.bf16.mxu0 %v1297_v62  ;;  %1332 = vmatpush1.bf16.msra.mxu1 %v1331_v39  ;;  %v1343_v62 = vpack.c.bf16 %v438_v58, %v436_v57  ;;  %v1351_v14 = vpack.c.bf16 %v446_v10, %v444_v9  ;;  %v82_v15 = vld [vmem:[%s2028_s0 + $0x40] sm:$0xff]  ;;  %v1353_v16 = vpack.c.bf16 %v451_v13, %v449_v12  ;;  %v85_v19 = vld [vmem:[%s2028_s0 + $0x58] sm:$0xff]  ;;  %v453_v20 = vld [vmem:[#allocation2 + $0x168] sm:$0xff] }
  0x59   :  { %1334 = vmatprep.subr.bf16.mxu1 %v1333_v41  ;;  %v448_v17 = vld [vmem:[#allocation2 + $0x140] sm:$0xff]  ;;  %v455_v21 = vld [vmem:[#allocation2 + $0x178] sm:$0xff]  ;;  %v454_v26 = vld [vmem:[#allocation2 + $0x170] sm:$0xff] }
  0x5a   :  { %v1357_v24 = vpack.c.bf16 %v455_v21, %v453_v20  ;;  %v452_v25 = vld [vmem:[#allocation2 + $0x160] sm:$0xff]  ;;  %v87_v27 = vld [vmem:[%s2028_s0 + $0x68] sm:$0xff]  ;;  %v459_v29 = vld [vmem:[#allocation2 + $0x198] sm:$0xff] }
  0x5b   :  { %1300 = vmatpush1.bf16.msra.mxu0 %v1299_v6  ;;  %v1347_v6 = vpack.c.bf16 %v442_v2, %v440_v1  ;;  %v457_v28 = vld [vmem:[#allocation2 + $0x188] sm:$0xff]  ;;  %v86_v31 = vld [vmem:[%s2028_s0 + $0x60] sm:$0xff]  ;;  %v458_v34 = vld [vmem:[#allocation2 + $0x190] sm:$0xff] }
  0x5c   :  { %1302 = vmatprep.subr.bf16.mxu0 %v1301_v11  ;;  %1336 = vmatpush1.bf16.msra.mxu1 %v1335_v46  ;;  %v83_v11 = vld [vmem:[%s2028_s0 + $0x48] sm:$0xff]  ;;  %v1361_v32 = vpack.c.bf16 %v459_v29, %v457_v28  ;;  %v456_v33 = vld [vmem:[#allocation2 + $0x180] sm:$0xff]  ;;  %v463_v37 = vld [vmem:[#allocation2 + $0x1b8] sm:$0xff] }
  0x5d   :  { %1338 = vmatprep.subr.bf16.mxu1 %v1337_v48  ;;  %v461_v36 = vld [vmem:[#allocation2 + $0x1a8] sm:$0xff]  ;;  %v1363_v38 = vpack.c.bf16 %v458_v34, %v456_v33  ;;  %v88_v39 = vld [vmem:[%s2028_s0 + $0x70] sm:$0xff]  ;;  %v460_v41 = vld [vmem:[#allocation2 + $0x1a0] sm:$0xff] }
  0x5e   :  { %v462_v42 = vld [vmem:[#allocation2 + $0x1b0] sm:$0xff]  ;;  %v91_v43 = vld [vmem:[%s2028_s0 + $0x88] sm:$0xff]  ;;  %v467_v45 = vld [vmem:[#allocation2 + $0x1d8] sm:$0xff] }
  0x5f   :  { %1304 = vmatpush1.bf16.msra.mxu0 %v1303_v18  ;;  %v450_v18 = vld [vmem:[#allocation2 + $0x150] sm:$0xff]  ;;  %v465_v44 = vld [vmem:[#allocation2 + $0x1c8] sm:$0xff]  ;;  %v1367_v46 = vpack.c.bf16 %v462_v42, %v460_v41  ;;  %v93_v49 = vld [vmem:[%s2028_s0 + $0x98] sm:$0xff] }
  0x60   :  { %1306 = vmatprep.subr.bf16.mxu0 %v1305_v23  ;;  %1340 = vmatpush1.bf16.msra.mxu1 %v1339_v54  ;;  %v1355_v22 = vpack.c.bf16 %v450_v18, %v448_v17  ;;  %v84_v23 = vld [vmem:[%s2028_s0 + $0x50] sm:$0xff]  ;;  %v1369_v48 = vpack.c.bf16 %v467_v45, %v465_v44  ;;  %v94_v52 = vld [vmem:[%s2028_s0 + $0xa0] sm:$0xff]  ;;  %v97_v53 = vld [vmem:[%s2028_s0 + $0xb8] sm:$0xff] }
  0x61   :  { %1342 = vmatprep.subr.bf16.mxu1 %v1341_v56  ;;  %v92_v50 = vld [vmem:[%s2028_s0 + $0x90] sm:$0xff]  ;;  %v98_v56 = vld [vmem:[%s2028_s0 + $0xc0] sm:$0xff]  ;;  %v101_v57 = vld [vmem:[%s2028_s0 + $0xd8] sm:$0xff] }
  0x62   :  { %v96_v54 = vld [vmem:[%s2028_s0 + $0xb0] sm:$0xff]  ;;  %v102_v60 = vld [vmem:[%s2028_s0 + $0xe0] sm:$0xff]  ;;  %v105_v61 = vld [vmem:[%s2028_s0 + $0xf8] sm:$0xff] }
  0x63   :  { %1308 = vmatpush1.bf16.msra.mxu0 %v1307_v30  ;;  %v1359_v30 = vpack.c.bf16 %v454_v26, %v452_v25  ;;  %v100_v58 = vld [vmem:[%s2028_s0 + $0xd0] sm:$0xff]  ;;  %v469_v2 = vld [vmem:[#allocation2 + $0x1e8] sm:$0xff]  ;;  %v468_v5 = vld [vmem:[#allocation2 + $0x1e0] sm:$0xff] }
  0x64   :  { %1310 = vmatprep.subr.bf16.mxu0 %v1309_v35  ;;  %1344 = vmatpush1.bf16.msra.mxu1 %v1343_v62  ;;  %v89_v35 = vld [vmem:[%s2028_s0 + $0x78] sm:$0xff]  ;;  %v104_v62 = vld [vmem:[%s2028_s0 + $0xf0] sm:$0xff]  ;;  %v694_v9 = vld [vmem:[#allocation5 + $0x88] sm:$0xff] }
  0x65   :  { %1346 = vmatprep.subr.bf16.mxu1 %v1345_v0  ;;  %v466_v0 = vld [vmem:[#allocation2 + $0x1d0] sm:$0xff]  ;;  %v677_v10 = vld [vmem:[#allocation5] sm:$0xff]  ;;  %v678_v12 = vld [vmem:[#allocation5 + $0x8] sm:$0xff] }
  0x66   :  { %v695_v13 = vld [vmem:[#allocation5 + $0x90] sm:$0xff]  ;;  %v680_v18 = vld [vmem:[#allocation5 + $0x18] sm:$0xff]  ;;  %v698_v20 = vld [vmem:[#allocation5 + $0xa8] sm:$0xff] }
  0x67   :  { %1312 = vmatpush1.bf16.msra.mxu0 %v1311_v40  ;;  %v1365_v40 = vpack.c.bf16 %v463_v37, %v461_v36  ;;  %v679_v17 = vld [vmem:[#allocation5 + $0x10] sm:$0xff]  ;;  %v700_v26 = vld [vmem:[#allocation5 + $0xb8] sm:$0xff]  ;;  %v686_v36 = vld [vmem:[#allocation5 + $0x48] sm:$0xff] }
  0x68   :  { %1348 = vmatpush1.bf16.msra.mxu1 %v1347_v6  ;;  %v470_v6 = vld [vmem:[#allocation2 + $0x1f0] sm:$0xff]  ;;  %v1383_v21 = vpack.c.bf16 %v680_v18, %v679_v17  ;;  %v688_v42 = vld [vmem:[#allocation5 + $0x58] sm:$0xff]  ;;  %v706_v44 = vld [vmem:[#allocation5 + $0xe8] sm:$0xff] }
  0x69   :  { %1350 = vmatprep.subr.bf16.mxu1 %v1349_v8  ;;  %v693_v8 = vld [vmem:[#allocation5 + $0x80] sm:$0xff]  ;;  %v699_v25 = vld [vmem:[#allocation5 + $0xb0] sm:$0xff] }
  0x6a   :  { %280 = vmatmul.mubr.f32.vlgmr.msra.gmra.mrb[0].mxu0 %v74_v47  ;;  %v90_v47 = vld [vmem:[%s2028_s0 + $0x80] sm:$0xff]  ;;  %v1389_v28 = vpack.c.bf16 %v700_v26, %v699_v25  ;;  %v683_v29 = vld [vmem:[#allocation5 + $0x30] sm:$0xff] }
  0x6b   :  { %1080 = vmatprep.mubr.msk.f32.mxu0 %vm166_vm0, %v77_v51  ;;  %v95_v51 = vld [vmem:[%s2028_s0 + $0xa8] sm:$0xff]  ;;  %v703_v37 = vld [vmem:[#allocation5 + $0xd0] sm:$0xff] }
  0x6c   :  { %1352 = vmatpush1.bf16.msra.mxu1 %v1351_v14  ;;  %v696_v14 = vld [vmem:[#allocation5 + $0x98] sm:$0xff]  ;;  %v687_v41 = vld [vmem:[#allocation5 + $0x50] sm:$0xff] }
  0x6d   :  { %1354 = vmatprep.subr.bf16.mxu1 %v1353_v16  ;;  %v1381_v16 = vpack.c.bf16 %v696_v14, %v695_v13  ;;  %v1399_v45 = vpack.c.bf16 %v688_v42, %v687_v41 }
  0x6e   :  { %286 = vmatmul.mubr.f32.gmra.mrb[2].mxu0 %v76_v55  ;;  %v99_v55 = vld [vmem:[%s2028_s0 + $0xc8] sm:$0xff] }
  0x6f   :  { %1081 = vmatprep.mubr.msk.f32.mxu0 %vm166_vm0, %v79_v59  ;;  %v103_v59 = vld [vmem:[%s2028_s0 + $0xe8] sm:$0xff] }
  0x70   :  { %1356 = vmatpush1.bf16.msra.mxu1 %v1355_v22 }
  0x71   :  { %1358 = vmatprep.subr.bf16.mxu1 %v1357_v24  ;;  %v682_v24 = vld [vmem:[#allocation5 + $0x28] sm:$0xff] }
  0x72   :  { %292 = vmatmul.mubr.f32.gmra.mrb[4].mxu0 %v78_v63  ;;  %v464_v63 = vld [vmem:[#allocation2 + $0x1c0] sm:$0xff] }
  0x73   :  { %1082 = vmatprep.mubr.msk.f32.mxu0 %vm166_vm0, %v81_v3  ;;  %v1371_v1 = vpack.c.bf16 %v466_v0, %v464_v63  ;;  %v471_v3 = vld [vmem:[#allocation2 + $0x1f8] sm:$0xff] }
  0x74   :  { %1360 = vmatpush1.bf16.msra.mxu1 %v1359_v30  ;;  %v1373_v4 = vpack.c.bf16 %v471_v3, %v469_v2  ;;  %v684_v30 = vld [vmem:[#allocation5 + $0x38] sm:$0xff] }
  0x75   :  { %1362 = vmatprep.subr.bf16.mxu1 %v1361_v32  ;;  %v702_v32 = vld [vmem:[#allocation5 + $0xc8] sm:$0xff]  ;;  %v1391_v33 = vpack.c.bf16 %v684_v30, %v683_v29 }
  0x76   :  { %298 = vmatmul.mubr.f32.gmra.mrb[6].mxu0 %v80_v7  ;;  %v1375_v7 = vpack.c.bf16 %v470_v6, %v468_v5 }
  0x77   :  { %1083 = vmatprep.mubr.msk.f32.mxu0 %vm166_vm0, %v83_v11  ;;  %v1377_v11 = vpack.c.bf16 %v694_v9, %v693_v8 }
  0x78   :  { %1364 = vmatpush1.bf16.msra.mxu1 %v1363_v38  ;;  %v704_v38 = vld [vmem:[#allocation5 + $0xd8] sm:$0xff] }
  0x79   :  { %1366 = vmatprep.subr.bf16.mxu1 %v1365_v40  ;;  %1378 = vmatprep.subr.bf16.mxu0 %v1377_v11  ;;  %v1397_v40 = vpack.c.bf16 %v704_v38, %v703_v37 }
  0x7a   :  { %304 = vmatmul.mubr.f32.gmra.mrb[8].mxu0 %v82_v15  ;;  %v1379_v15 = vpack.c.bf16 %v678_v12, %v677_v10 }
  0x7b   :  { %1084 = vmatprep.mubr.msk.f32.mxu0 %vm166_vm0, %v85_v19  ;;  %v697_v19 = vld [vmem:[#allocation5 + $0xa0] sm:$0xff] }
  0x7c   :  { %1368 = vmatpush1.bf16.msra.mxu1 %v1367_v46  ;;  %1380 = vmatpush3.bf16.msra.mxu0 %v1379_v15  ;;  %v1385_v22 = vpack.c.bf16 %v698_v20, %v697_v19 }
  0x7d   :  { %1370 = vmatprep.subr.bf16.mxu1 %v1369_v48  ;;  %1382 = vmatprep.subr.bf16.mxu0 %v1381_v16  ;;  %v690_v48 = vld [vmem:[#allocation5 + $0x68] sm:$0xff] }
  0x7e   :  { %310 = vmatmul.mubr.f32.gmra.mrb[10].mxu0 %v84_v23  ;;  %v681_v23 = vld [vmem:[#allocation5 + $0x20] sm:$0xff] }
  0x7f   :  { %1085 = vmatprep.mubr.msk.f32.mxu0 %vm166_vm0, %v87_v27  ;;  %v1387_v27 = vpack.c.bf16 %v682_v24, %v681_v23 }
  0x80   :  { %1372 = vmatpush1.bf16.msra.mxu1 %v1371_v1  ;;  %1384 = vmatpush3.bf16.msra.mxu0 %v1383_v21 }
  0x81   :  { %1374 = vmatprep.subr.bf16.mxu1 %v1373_v4  ;;  %1386 = vmatprep.subr.bf16.mxu0 %v1385_v22 }
  0x82   :  { %316 = vmatmul.mubr.f32.gmra.mrb[12].mxu0 %v86_v31  ;;  %v701_v31 = vld [vmem:[#allocation5 + $0xc0] sm:$0xff] }
  0x83   :  { %1086 = vmatprep.mubr.msk.f32.mxu0 %vm166_vm0, %v89_v35  ;;  %v1393_v34 = vpack.c.bf16 %v702_v32, %v701_v31  ;;  %v685_v35 = vld [vmem:[#allocation5 + $0x40] sm:$0xff] }
  0x84   :  { %1376 = vmatpush1.bf16.msra.mxu1 %v1375_v7  ;;  %1388 = vmatpush3.bf16.msra.mxu0 %v1387_v27 }
  0x85   :  { %1390 = vmatprep.subr.bf16.mxu0 %v1389_v28 }
  0x86   :  { %322 = vmatmul.mubr.f32.gmra.mrb[14].mxu0 %v88_v39  ;;  %v1395_v39 = vpack.c.bf16 %v686_v36, %v685_v35 }
  0x87   :  { %1087 = vmatprep.mubr.msk.f32.mxu0 %vm166_vm0, %v91_v43  ;;  %v705_v43 = vld [vmem:[#allocation5 + $0xe0] sm:$0xff] }
  0x88   :  { %1392 = vmatpush3.bf16.msra.mxu0 %v1391_v33  ;;  %v1401_v46 = vpack.c.bf16 %v706_v44, %v705_v43 }
  0x89   :  { %1394 = vmatprep.subr.bf16.mxu0 %v1393_v34 }
  0x8a   :  { %328 = vmatmul.mubr.f32.gmra.mrb[16].mxu0 %v90_v47  ;;  %v689_v47 = vld [vmem:[#allocation5 + $0x60] sm:$0xff] }
  0x8b   :  { %1088 = vmatprep.mubr.msk.f32.mxu0 %vm166_vm0, %v93_v49  ;;  %v707_v49 = vld [vmem:[#allocation5 + $0xf0] sm:$0xff] }
  0x8c   :  { %1396 = vmatpush3.bf16.msra.mxu0 %v1395_v39 }
  0x8d   :  { %1398 = vmatprep.subr.bf16.mxu0 %v1397_v40 }
  0x8e   :  { %334 = vmatmul.mubr.f32.gmra.mrb[18].mxu0 %v92_v50  ;;  %v708_v50 = vld [vmem:[#allocation5 + $0xf8] sm:$0xff] }
  0x8f   :  { %1089 = vmatprep.mubr.msk.f32.mxu0 %vm166_vm0, %v95_v51  ;;  %v1403_v51 = vpack.c.bf16 %v690_v48, %v689_v47 }
  0x90   :  { %1400 = vmatpush3.bf16.msra.mxu0 %v1399_v45 }
  0x91   :  { %1402 = vmatprep.subr.bf16.mxu0 %v1401_v46 }
  0x92   :  { %340 = vmatmul.mubr.f32.gmra.mrb[20].mxu0 %v94_v52  ;;  %v1405_v52 = vpack.c.bf16 %v708_v50, %v707_v49 }
  0x93   :  { %1090 = vmatprep.mubr.msk.f32.mxu0 %vm166_vm0, %v97_v53  ;;  %v691_v53 = vld [vmem:[#allocation5 + $0x70] sm:$0xff] }
  0x94   :  { %1404 = vmatpush3.bf16.msra.mxu0 %v1403_v51 }
  0x95   :  { %1406 = vmatprep.subr.bf16.mxu0 %v1405_v52 }
  0x96   :  { %346 = vmatmul.mubr.f32.gmra.mrb[22].mxu0 %v96_v54  ;;  %v692_v54 = vld [vmem:[#allocation5 + $0x78] sm:$0xff] }
  0x97   :  { %1091 = vmatprep.mubr.msk.f32.mxu0 %vm166_vm0, %v99_v55  ;;  %v1407_v55 = vpack.c.bf16 %v692_v54, %v691_v53 }
  0x99   :  { %1408 = vmatpush3.bf16.msra.mxu0 %v1407_v55 }
  0x9a   :  { %352 = vmatmul.mubr.f32.gmra.mrb[24].mxu0 %v98_v56  ;;  %v156_v56 = vlaneseq }
  0x9b   :  { %1092 = vmatprep.mubr.msk.f32.mxu0 %vm166_vm0, %v101_v57 }
  0x9c   :  { %v1899_v57 = vshrl.u32 %v156_v56, 7 }
  0x9e   :  { %358 = vmatmul.mubr.f32.gmra.mrb[26].mxu0 %v100_v58  ;;  %v158_v58 = vsub.s32 0, %v1899_v57 }
  0x9f   :  { %1093 = vmatprep.mubr.msk.f32.mxu0 %vm166_vm0, %v103_v59  ;;  %v154_v59 = vld [vmem:[%s2030_s2] sm:$0x3] }
  0xa2   :  { %364 = vmatmul.mubr.f32.gmra.mrb[28].mxu0 %v102_v60  ;;  %v162_v60 = vsub.s32 1, %v1899_v57 }
  0xa3   :  { %1094 = vmatprep.mubr.msk.f32.mxu0 %vm166_vm0, %v105_v61  ;;  %v1908_v61 = vrot.slane %v154_v59, %v158_v58 }
  0xa6   :  { %370 = vmatmul.mubr.f32.gmra.mrb[30].mxu0 %v104_v62  ;;  %v1912_v62 = vrot.slane %v154_v59, %v162_v60 }
 0x13d   :  { %v281_v63 = vpop.f32.mrb[0].mxu0 }
 0x13e   :  { %v282_v0 = vadd.f32 %v281_v63, %v1908_v61  ;;  %v283_v1 = vpop.f32.mrb[1].mxu0 }
 0x13f   :  { %v284_v2 = vadd.f32 %v283_v1, %v1912_v62 }
 0x140   :  { %v376_v5 = vmax.f32 %v282_v0, 0.0 }
 0x141   :  { %v287_v3 = vpop.f32.mrb[2].mxu0  ;;  %v377_v4 = vmax.f32 %v284_v2, 0.0 }
 0x142   :  { %v288_v6 = vadd.f32 %v287_v3, %v1908_v61  ;;  %v289_v7 = vpop.f32.mrb[3].mxu0 }
 0x143   :  { %v290_v8 = vadd.f32 %v289_v7, %v1912_v62  ;;  %548 = vmatprep.mubr.f32.mxu1 %v377_v4 }
 0x144   :  { %549 = vmatmul.mubr.f32.vlgmr.msra.gmra.mrb[0].mxu1 %v376_v5  ;;  %v378_v11 = vmax.f32 %v288_v6, 0.0 }
 0x145   :  { %v379_v9 = vmax.f32 %v290_v8, 0.0  ;;  %v293_v10 = vpop.f32.mrb[4].mxu0 }
 0x146   :  { %v294_v12 = vadd.f32 %v293_v10, %v1908_v61  ;;  %v295_v13 = vpop.f32.mrb[5].mxu0 }
 0x147   :  { %v296_v14 = vadd.f32 %v295_v13, %v1912_v62  ;;  %554 = vmatprep.mubr.f32.mxu1 %v379_v9 }
 0x148   :  { %555 = vmatmul.mubr.f32.gmra.mrb[2].mxu1 %v378_v11  ;;  %v380_v17 = vmax.f32 %v294_v12, 0.0 }
 0x149   :  { %v381_v15 = vmax.f32 %v296_v14, 0.0  ;;  %v299_v16 = vpop.f32.mrb[6].mxu0 }
 0x14a   :  { %v300_v18 = vadd.f32 %v299_v16, %v1908_v61  ;;  %v301_v19 = vpop.f32.mrb[7].mxu0 }
 0x14b   :  { %v302_v20 = vadd.f32 %v301_v19, %v1912_v62  ;;  %560 = vmatprep.mubr.f32.mxu1 %v381_v15 }
 0x14c   :  { %561 = vmatmul.mubr.f32.gmra.mrb[4].mxu1 %v380_v17  ;;  %v382_v23 = vmax.f32 %v300_v18, 0.0 }
 0x14d   :  { %v383_v21 = vmax.f32 %v302_v20, 0.0  ;;  %v305_v22 = vpop.f32.mrb[8].mxu0 }
 0x14e   :  { %v306_v24 = vadd.f32 %v305_v22, %v1908_v61  ;;  %v307_v25 = vpop.f32.mrb[9].mxu0 }
 0x14f   :  { %v308_v26 = vadd.f32 %v307_v25, %v1912_v62  ;;  %566 = vmatprep.mubr.f32.mxu1 %v383_v21 }
 0x150   :  { %567 = vmatmul.mubr.f32.gmra.mrb[6].mxu1 %v382_v23  ;;  %v384_v29 = vmax.f32 %v306_v24, 0.0 }
 0x151   :  { %v385_v27 = vmax.f32 %v308_v26, 0.0  ;;  %v311_v28 = vpop.f32.mrb[10].mxu0 }
 0x152   :  { %v312_v30 = vadd.f32 %v311_v28, %v1908_v61  ;;  %v313_v31 = vpop.f32.mrb[11].mxu0 }
 0x153   :  { %v314_v32 = vadd.f32 %v313_v31, %v1912_v62  ;;  %572 = vmatprep.mubr.f32.mxu1 %v385_v27 }
 0x154   :  { %573 = vmatmul.mubr.f32.gmra.mrb[8].mxu1 %v384_v29  ;;  %v386_v35 = vmax.f32 %v312_v30, 0.0 }
 0x155   :  { %v387_v33 = vmax.f32 %v314_v32, 0.0  ;;  %v317_v34 = vpop.f32.mrb[12].mxu0 }
 0x156   :  { %v318_v36 = vadd.f32 %v317_v34, %v1908_v61  ;;  %v319_v37 = vpop.f32.mrb[13].mxu0 }
 0x157   :  { %v320_v38 = vadd.f32 %v319_v37, %v1912_v62  ;;  %578 = vmatprep.mubr.f32.mxu1 %v387_v33  ;;  %v878_v37 = vld [vmem:[#allocation7 + $0x8] sm:$0xff] }
 0x158   :  { %579 = vmatmul.mubr.f32.gmra.mrb[10].mxu1 %v386_v35  ;;  %v388_v41 = vmax.f32 %v318_v36, 0.0  ;;  %v877_v36 = vld [vmem:[#allocation7] sm:$0xff] }
 0x159   :  { %v389_v39 = vmax.f32 %v320_v38, 0.0  ;;  %v323_v40 = vpop.f32.mrb[14].mxu0  ;;  %v879_v38 = vld [vmem:[#allocation7 + $0x10] sm:$0xff] }
 0x15a   :  { %v324_v42 = vadd.f32 %v323_v40, %v1908_v61  ;;  %v325_v43 = vpop.f32.mrb[15].mxu0  ;;  %v880_v40 = vld [vmem:[#allocation7 + $0x18] sm:$0xff] }
 0x15b   :  { %v326_v44 = vadd.f32 %v325_v43, %v1912_v62  ;;  %584 = vmatprep.mubr.f32.mxu1 %v389_v39  ;;  %v1409_v39 = vpack.c.bf16 %v878_v37, %v877_v36  ;;  %v882_v43 = vld [vmem:[#allocation7 + $0x28] sm:$0xff] }
 0x15c   :  { %585 = vmatmul.mubr.f32.gmra.mrb[12].mxu1 %v388_v41  ;;  %v390_v47 = vmax.f32 %v324_v42, 0.0  ;;  %v1413_v41 = vpack.c.bf16 %v880_v40, %v879_v38  ;;  %v881_v42 = vld [vmem:[#allocation7 + $0x20] sm:$0xff] }
 0x15d   :  { %v391_v45 = vmax.f32 %v326_v44, 0.0  ;;  %v329_v46 = vpop.f32.mrb[16].mxu0  ;;  %1410 = vmatprep.subr.bf16.mxu1 %v1409_v39  ;;  %v883_v44 = vld [vmem:[#allocation7 + $0x30] sm:$0xff] }
 0x15e   :  { %v330_v48 = vadd.f32 %v329_v46, %v1908_v61  ;;  %v331_v49 = vpop.f32.mrb[17].mxu0  ;;  %1412 = vmatpush3.bf16.msra.mxu1 %v1409_v39  ;;  %v885_v46 = vld [vmem:[#allocation7 + $0x40] sm:$0xff] }
 0x15f   :  { %v332_v50 = vadd.f32 %v331_v49, %v1912_v62  ;;  %590 = vmatprep.mubr.f32.mxu1 %v391_v45  ;;  %1414 = vmatprep.subr.bf16.mxu1 %v1413_v41  ;;  %v472_v49 = vld [vmem:[%s2032_s4] sm:$0x3] }
 0x160   :  { %591 = vmatmul.mubr.f32.gmra.mrb[14].mxu1 %v390_v47  ;;  %v392_v53 = vmax.f32 %v330_v48, 0.0  ;;  %v886_v47 = vld [vmem:[#allocation7 + $0x48] sm:$0xff] }
 0x161   :  { %v393_v51 = vmax.f32 %v332_v50, 0.0  ;;  %v335_v52 = vpop.f32.mrb[18].mxu0  ;;  %v1425_v48 = vpack.c.bf16 %v886_v47, %v885_v46  ;;  %v1951_v50 = vrot.slane %v472_v49, %v158_v58 }
 0x162   :  { %v336_v54 = vadd.f32 %v335_v52, %v1908_v61  ;;  %v337_v55 = vpop.f32.mrb[19].mxu0  ;;  %1416 = vmatpush3.bf16.msra.mxu1 %v1413_v41 }
 0x163   :  { %v338_v56 = vadd.f32 %v337_v55, %v1912_v62  ;;  %596 = vmatprep.mubr.f32.mxu1 %v393_v51  ;;  %v1955_v51 = vrot.slane %v472_v49, %v162_v60 }
 0x164   :  { %597 = vmatmul.mubr.f32.gmra.mrb[16].mxu1 %v392_v53  ;;  %v394_v0 = vmax.f32 %v336_v54, 0.0 }
 0x165   :  { %v395_v59 = vmax.f32 %v338_v56, 0.0  ;;  %v341_v63 = vpop.f32.mrb[20].mxu0 }
 0x166   :  { %v342_v1 = vadd.f32 %v341_v63, %v1908_v61  ;;  %v343_v2 = vpop.f32.mrb[21].mxu0 }
 0x167   :  { %v344_v3 = vadd.f32 %v343_v2, %v1912_v62  ;;  %602 = vmatprep.mubr.f32.mxu1 %v395_v59 }
 0x168   :  { %603 = vmatmul.mubr.f32.gmra.mrb[18].mxu1 %v394_v0  ;;  %v396_v6 = vmax.f32 %v342_v1, 0.0 }
 0x169   :  { %v397_v4 = vmax.f32 %v344_v3, 0.0  ;;  %v347_v5 = vpop.f32.mrb[22].mxu0 }
 0x16a   :  { %v348_v7 = vadd.f32 %v347_v5, %v1908_v61  ;;  %v349_v8 = vpop.f32.mrb[23].mxu0 }
 0x16b   :  { %v350_v9 = vadd.f32 %v349_v8, %v1912_v62  ;;  %608 = vmatprep.mubr.f32.mxu1 %v397_v4 }
 0x16c   :  { %609 = vmatmul.mubr.f32.gmra.mrb[20].mxu1 %v396_v6  ;;  %v398_v12 = vmax.f32 %v348_v7, 0.0 }
 0x16d   :  { %v399_v10 = vmax.f32 %v350_v9, 0.0  ;;  %v353_v11 = vpop.f32.mrb[24].mxu0 }
 0x16e   :  { %v354_v13 = vadd.f32 %v353_v11, %v1908_v61  ;;  %v355_v14 = vpop.f32.mrb[25].mxu0 }
 0x16f   :  { %v356_v15 = vadd.f32 %v355_v14, %v1912_v62  ;;  %614 = vmatprep.mubr.f32.mxu1 %v399_v10 }
 0x170   :  { %615 = vmatmul.mubr.f32.gmra.mrb[22].mxu1 %v398_v12  ;;  %v400_v18 = vmax.f32 %v354_v13, 0.0 }
 0x171   :  { %v401_v16 = vmax.f32 %v356_v15, 0.0  ;;  %v359_v17 = vpop.f32.mrb[26].mxu0 }
 0x172   :  { %v360_v19 = vadd.f32 %v359_v17, %v1908_v61  ;;  %v361_v20 = vpop.f32.mrb[27].mxu0 }
 0x173   :  { %v362_v21 = vadd.f32 %v361_v20, %v1912_v62  ;;  %620 = vmatprep.mubr.f32.mxu1 %v401_v16 }
 0x174   :  { %621 = vmatmul.mubr.f32.gmra.mrb[24].mxu1 %v400_v18  ;;  %v402_v24 = vmax.f32 %v360_v19, 0.0 }
 0x175   :  { %v403_v22 = vmax.f32 %v362_v21, 0.0  ;;  %v365_v23 = vpop.f32.mrb[28].mxu0 }
 0x176   :  { %v366_v25 = vadd.f32 %v365_v23, %v1908_v61  ;;  %v367_v26 = vpop.f32.mrb[29].mxu0 }
 0x177   :  { %v368_v27 = vadd.f32 %v367_v26, %v1912_v62  ;;  %626 = vmatprep.mubr.f32.mxu1 %v403_v22 }
 0x178   :  { %627 = vmatmul.mubr.f32.gmra.mrb[26].mxu1 %v402_v24  ;;  %v404_v30 = vmax.f32 %v366_v25, 0.0 }
 0x179   :  { %v405_v28 = vmax.f32 %v368_v27, 0.0  ;;  %v371_v29 = vpop.f32.mrb[30].mxu0 }
 0x17a   :  { %v372_v31 = vadd.f32 %v371_v29, %v1908_v61  ;;  %v373_v32 = vpop.f32.mrb[31].mxu0  ;;  %v1417_v61 = vpack.c.bf16 %v882_v43, %v881_v42 }
 0x17b   :  { %v374_v33 = vadd.f32 %v373_v32, %v1912_v62  ;;  %632 = vmatprep.mubr.f32.mxu1 %v405_v28  ;;  %v884_v62 = vld [vmem:[#allocation7 + $0x38] sm:$0xff] }
 0x17c   :  { %633 = vmatmul.mubr.f32.gmra.mrb[28].mxu1 %v404_v30  ;;  %v406_v35 = vmax.f32 %v372_v31, 0.0  ;;  %1418 = vmatprep.subr.bf16.mxu1 %v1417_v61  ;;  %v1421_v45 = vpack.c.bf16 %v884_v62, %v883_v44 }
 0x17d   :  { %v407_v34 = vmax.f32 %v374_v33, 0.0  ;;  %1420 = vmatpush3.bf16.msra.mxu1 %v1417_v61 }
 0x17e   :  { %1422 = vmatprep.subr.bf16.mxu1 %v1421_v45 }
 0x17f   :  { %638 = vmatprep.mubr.f32.mxu1 %v407_v34 }
 0x180   :  { %639 = vmatmul.mubr.f32.gmra.mrb[30].mxu1 %v406_v35 }
 0x181   :  { %1424 = vmatpush3.bf16.msra.mxu1 %v1421_v45 }
 0x182   :  { %1426 = vmatprep.subr.bf16.mxu1 %v1425_v48 }
 0x185   :  { %1428 = vmatpush3.bf16.msra.mxu1 %v1425_v48 }
 0x217   :  { %v550_v52 = vpop.f32.mrb[0].mxu1 }
 0x218   :  { %v551_v53 = vadd.f32 %v550_v52, %v1951_v50  ;;  %v552_v54 = vpop.f32.mrb[1].mxu1 }
 0x219   :  { %v553_v55 = vadd.f32 %v552_v54, %v1955_v51 }
 0x21a   :  { %v645_v63 = vmax.f32 %v551_v53, 0.0 }
 0x21b   :  { %v646_v56 = vmax.f32 %v553_v55, 0.0  ;;  %v556_v59 = vpop.f32.mrb[2].mxu1 }
 0x21c   :  { %v557_v0 = vadd.f32 %v556_v59, %v1951_v50  ;;  %v558_v1 = vpop.f32.mrb[3].mxu1 }
 0x21d   :  { %v559_v2 = vadd.f32 %v558_v1, %v1955_v51  ;;  %780 = vmatprep.mubr.f32.mxu0 %v646_v56 }
 0x21e   :  { %781 = vmatmul.mubr.f32.vlgmr.msra.gmra.mrb[32].mxu0 %v645_v63  ;;  %v647_v60 = vmax.f32 %v557_v0, 0.0 }
 0x21f   :  { %v648_v58 = vmax.f32 %v559_v2, 0.0  ;;  %v562_v57 = vpop.f32.mrb[4].mxu1 }
 0x220   :  { %v563_v3 = vadd.f32 %v562_v57, %v1951_v50  ;;  %v564_v4 = vpop.f32.mrb[5].mxu1 }
 0x221   :  { %v565_v5 = vadd.f32 %v564_v4, %v1955_v51  ;;  %785 = vmatprep.mubr.f32.mxu0 %v648_v58 }
 0x222   :  { %786 = vmatmul.mubr.f32.gmra.mrb[34].mxu0 %v647_v60  ;;  %v649_v8 = vmax.f32 %v563_v3, 0.0 }
 0x223   :  { %v650_v6 = vmax.f32 %v565_v5, 0.0  ;;  %v568_v7 = vpop.f32.mrb[6].mxu1 }
 0x224   :  { %v569_v9 = vadd.f32 %v568_v7, %v1951_v50  ;;  %v570_v10 = vpop.f32.mrb[7].mxu1 }
 0x225   :  { %v571_v11 = vadd.f32 %v570_v10, %v1955_v51  ;;  %790 = vmatprep.mubr.f32.mxu0 %v650_v6 }
 0x226   :  { %791 = vmatmul.mubr.f32.gmra.mrb[36].mxu0 %v649_v8  ;;  %v651_v14 = vmax.f32 %v569_v9, 0.0 }
 0x227   :  { %v652_v12 = vmax.f32 %v571_v11, 0.0  ;;  %v574_v13 = vpop.f32.mrb[8].mxu1 }
 0x228   :  { %v575_v15 = vadd.f32 %v574_v13, %v1951_v50  ;;  %v576_v16 = vpop.f32.mrb[9].mxu1 }
 0x229   :  { %v577_v17 = vadd.f32 %v576_v16, %v1955_v51  ;;  %795 = vmatprep.mubr.f32.mxu0 %v652_v12 }
 0x22a   :  { %796 = vmatmul.mubr.f32.gmra.mrb[38].mxu0 %v651_v14  ;;  %v653_v20 = vmax.f32 %v575_v15, 0.0 }
 0x22b   :  { %v654_v18 = vmax.f32 %v577_v17, 0.0  ;;  %v580_v19 = vpop.f32.mrb[10].mxu1 }
 0x22c   :  { %v581_v21 = vadd.f32 %v580_v19, %v1951_v50  ;;  %v582_v22 = vpop.f32.mrb[11].mxu1 }
 0x22d   :  { %v583_v23 = vadd.f32 %v582_v22, %v1955_v51  ;;  %800 = vmatprep.mubr.f32.mxu0 %v654_v18 }
 0x22e   :  { %801 = vmatmul.mubr.f32.gmra.mrb[40].mxu0 %v653_v20  ;;  %v655_v26 = vmax.f32 %v581_v21, 0.0 }
 0x22f   :  { %v656_v24 = vmax.f32 %v583_v23, 0.0  ;;  %v586_v25 = vpop.f32.mrb[12].mxu1 }
 0x230   :  { %v587_v27 = vadd.f32 %v586_v25, %v1951_v50  ;;  %v588_v28 = vpop.f32.mrb[13].mxu1  ;;  %v888_v25 = vld [vmem:[#allocation7 + $0x58] sm:$0xff] }
 0x231   :  { %v589_v29 = vadd.f32 %v588_v28, %v1955_v51  ;;  %805 = vmatprep.mubr.f32.mxu0 %v656_v24  ;;  %v887_v24 = vld [vmem:[#allocation7 + $0x50] sm:$0xff]  ;;  %v890_v28 = vld [vmem:[#allocation7 + $0x68] sm:$0xff] }
 0x232   :  { %806 = vmatmul.mubr.f32.gmra.mrb[42].mxu0 %v655_v26  ;;  %v657_v32 = vmax.f32 %v587_v27, 0.0  ;;  %v1429_v26 = vpack.c.bf16 %v888_v25, %v887_v24  ;;  %v889_v27 = vld [vmem:[#allocation7 + $0x60] sm:$0xff] }
 0x233   :  { %v658_v30 = vmax.f32 %v589_v29, 0.0  ;;  %v592_v31 = vpop.f32.mrb[14].mxu1  ;;  %v1433_v29 = vpack.c.bf16 %v890_v28, %v889_v27 }
 0x234   :  { %v593_v33 = vadd.f32 %v592_v31, %v1951_v50  ;;  %v594_v34 = vpop.f32.mrb[15].mxu1  ;;  %1430 = vmatprep.subr.bf16.mxu1 %v1429_v26 }
 0x235   :  { %v595_v35 = vadd.f32 %v594_v34, %v1955_v51  ;;  %810 = vmatprep.mubr.f32.mxu0 %v658_v30  ;;  %1432 = vmatpush3.bf16.msra.mxu1 %v1429_v26  ;;  %v892_v30 = vld [vmem:[#allocation7 + $0x78] sm:$0xff] }
 0x236   :  { %811 = vmatmul.mubr.f32.gmra.mrb[44].mxu0 %v657_v32  ;;  %v659_v38 = vmax.f32 %v593_v33, 0.0  ;;  %1434 = vmatprep.subr.bf16.mxu1 %v1433_v29  ;;  %v1992_v32 = vld [vmem:[%s2034_s6] ss:$0 sm:$0xff] }
 0x237   :  { %v660_v36 = vmax.f32 %v595_v35, 0.0  ;;  %v598_v37 = vpop.f32.mrb[16].mxu1 }
 0x238   :  { %v599_v39 = vadd.f32 %v598_v37, %v1951_v50  ;;  %v600_v40 = vpop.f32.mrb[17].mxu1 }
 0x239   :  { %v601_v41 = vadd.f32 %v600_v40, %v1955_v51  ;;  %815 = vmatprep.mubr.f32.mxu0 %v660_v36  ;;  %1436 = vmatpush3.bf16.msra.mxu1 %v1433_v29 }
 0x23a   :  { %816 = vmatmul.mubr.f32.gmra.mrb[46].mxu0 %v659_v38  ;;  %v661_v61 = vmax.f32 %v599_v39, 0.0 }
 0x23b   :  { %v662_v42 = vmax.f32 %v601_v41, 0.0  ;;  %v604_v43 = vpop.f32.mrb[18].mxu1 }
 0x23c   :  { %v605_v44 = vadd.f32 %v604_v43, %v1951_v50  ;;  %v606_v62 = vpop.f32.mrb[19].mxu1 }
 0x23d   :  { %v607_v45 = vadd.f32 %v606_v62, %v1955_v51  ;;  %820 = vmatprep.mubr.f32.mxu0 %v662_v42 }
 0x23e   :  { %821 = vmatmul.mubr.f32.gmra.mrb[48].mxu0 %v661_v61  ;;  %v663_v48 = vmax.f32 %v605_v44, 0.0 }
 0x23f   :  { %v664_v46 = vmax.f32 %v607_v45, 0.0  ;;  %v610_v47 = vpop.f32.mrb[20].mxu1 }
 0x240   :  { %v611_v49 = vadd.f32 %v610_v47, %v1951_v50  ;;  %v612_v52 = vpop.f32.mrb[21].mxu1 }
 0x241   :  { %v613_v53 = vadd.f32 %v612_v52, %v1955_v51  ;;  %825 = vmatprep.mubr.f32.mxu0 %v664_v46 }
 0x242   :  { %826 = vmatmul.mubr.f32.gmra.mrb[50].mxu0 %v663_v48  ;;  %v665_v56 = vmax.f32 %v611_v49, 0.0 }
 0x243   :  { %v666_v54 = vmax.f32 %v613_v53, 0.0  ;;  %v616_v55 = vpop.f32.mrb[22].mxu1 }
 0x244   :  { %v617_v59 = vadd.f32 %v616_v55, %v1951_v50  ;;  %v618_v63 = vpop.f32.mrb[23].mxu1 }
 0x245   :  { %v619_v0 = vadd.f32 %v618_v63, %v1955_v51  ;;  %830 = vmatprep.mubr.f32.mxu0 %v666_v54 }
 0x246   :  { %831 = vmatmul.mubr.f32.gmra.mrb[52].mxu0 %v665_v56  ;;  %v667_v58 = vmax.f32 %v617_v59, 0.0 }
 0x247   :  { %v668_v1 = vmax.f32 %v619_v0, 0.0  ;;  %v622_v2 = vpop.f32.mrb[24].mxu1 }
 0x248   :  { %v623_v57 = vadd.f32 %v622_v2, %v1951_v50  ;;  %v624_v60 = vpop.f32.mrb[25].mxu1 }
 0x249   :  { %v625_v3 = vadd.f32 %v624_v60, %v1955_v51  ;;  %835 = vmatprep.mubr.f32.mxu0 %v668_v1 }
 0x24a   :  { %836 = vmatmul.mubr.f32.gmra.mrb[54].mxu0 %v667_v58  ;;  %v669_v6 = vmax.f32 %v623_v57, 0.0 }
 0x24b   :  { %v670_v4 = vmax.f32 %v625_v3, 0.0  ;;  %v628_v5 = vpop.f32.mrb[26].mxu1 }
 0x24c   :  { %v629_v7 = vadd.f32 %v628_v5, %v1951_v50  ;;  %v630_v8 = vpop.f32.mrb[27].mxu1 }
 0x24d   :  { %v631_v9 = vadd.f32 %v630_v8, %v1955_v51  ;;  %840 = vmatprep.mubr.f32.mxu0 %v670_v4 }
 0x24e   :  { %841 = vmatmul.mubr.f32.gmra.mrb[56].mxu0 %v669_v6  ;;  %v671_v12 = vmax.f32 %v629_v7, 0.0 }
 0x24f   :  { %v672_v10 = vmax.f32 %v631_v9, 0.0  ;;  %v634_v11 = vpop.f32.mrb[28].mxu1 }
 0x250   :  { %v635_v13 = vadd.f32 %v634_v11, %v1951_v50  ;;  %v636_v14 = vpop.f32.mrb[29].mxu1 }
 0x251   :  { %v637_v15 = vadd.f32 %v636_v14, %v1955_v51  ;;  %845 = vmatprep.mubr.f32.mxu0 %v672_v10 }
 0x252   :  { %846 = vmatmul.mubr.f32.gmra.mrb[58].mxu0 %v671_v12  ;;  %v673_v18 = vmax.f32 %v635_v13, 0.0 }
 0x253   :  { %v674_v16 = vmax.f32 %v637_v15, 0.0  ;;  %v640_v17 = vpop.f32.mrb[30].mxu1 }
 0x254   :  { %v641_v19 = vadd.f32 %v640_v17, %v1951_v50  ;;  %v642_v20 = vpop.f32.mrb[31].mxu1  ;;  %v891_v50 = vld [vmem:[#allocation7 + $0x70] sm:$0xff] }
 0x255   :  { %v643_v21 = vadd.f32 %v642_v20, %v1955_v51  ;;  %850 = vmatprep.mubr.f32.mxu0 %v674_v16  ;;  %v1437_v31 = vpack.c.bf16 %v892_v30, %v891_v50 }
 0x256   :  { %851 = vmatmul.mubr.f32.gmra.mrb[60].mxu0 %v673_v18  ;;  %v675_v23 = vmax.f32 %v641_v19, 0.0 }
 0x257   :  { %v676_v22 = vmax.f32 %v643_v21, 0.0  ;;  %1438 = vmatprep.subr.bf16.mxu1 %v1437_v31 }
 0x258   :  { %1440 = vmatpush3.bf16.msra.mxu1 %v1437_v31 }
 0x259   :  { %855 = vmatprep.mubr.f32.mxu0 %v676_v22 }
 0x25a   :  { %856 = vmatmul.mubr.f32.gmra.mrb[62].mxu0 %v675_v23 }
 0x2f1   :  { %v1129_v51 = vpop.f32.mrb[32].mxu0 }
 0x2f2   :  { %v1130_v33 = vpop.f32.mrb[33].mxu0 }
 0x2f3   :  { %v1131_v34 = vadd.f32 %v1130_v33, %v1129_v51 }
 0x2f5   :  { %v783_v35 = vadd.f32 %v1131_v34, %v1992_v32  ;;  %v1132_v36 = vpop.f32.mrb[34].mxu0 }
 0x2f6   :  { %v1133_v37 = vpop.f32.mrb[35].mxu0 }
 0x2f7   :  { %v861_v38 = vmax.f32 %v783_v35, 0.0  ;;  %v1134_v39 = vadd.f32 %v1133_v37, %v1132_v36 }
 0x2f9   :  { %v788_v40 = vadd.f32 %v1134_v39, %v1992_v32  ;;  %v1135_v41 = vpop.f32.mrb[36].mxu0  ;;  %1241 = vmatprep.mubr.f32.mxu1 %v861_v38 }
 0x2fa   :  { %v1136_v42 = vpop.f32.mrb[37].mxu0 }
 0x2fb   :  { %v862_v43 = vmax.f32 %v788_v40, 0.0  ;;  %v1137_v61 = vadd.f32 %v1136_v42, %v1135_v41 }
 0x2fd   :  { %v793_v44 = vadd.f32 %v1137_v61, %v1992_v32  ;;  %v1138_v62 = vpop.f32.mrb[38].mxu0  ;;  %1242 = vmatmul.mubr.f32.vlgmr.msra.gmra.mrb[32].mxu1 %v862_v43 }
 0x2fe   :  { %v1139_v45 = vpop.f32.mrb[39].mxu0 }
 0x2ff   :  { %v863_v46 = vmax.f32 %v793_v44, 0.0  ;;  %v1140_v47 = vadd.f32 %v1139_v45, %v1138_v62 }
 0x301   :  { %v798_v48 = vadd.f32 %v1140_v47, %v1992_v32  ;;  %v1141_v49 = vpop.f32.mrb[40].mxu0  ;;  %1244 = vmatprep.mubr.f32.mxu1 %v863_v46  ;;  %v1096_v47 = vld [vmem:[%s2036_s8] ss:$0 sm:$0xff]  ;;  %s1550_s8 = smov [#allocation8]  }
 0x302   :  { %v1142_v52 = vpop.f32.mrb[41].mxu0  ;;  %s1066_s13 = sshll.u32 %s1550_s8, 4  ;;  %s1067_s13 = int_to_ptr.vmem [resolvable:$true] %s1066_s13 }
 0x303   :  { %v864_v53 = vmax.f32 %v798_v48, 0.0  ;;  %v1143_v54 = vadd.f32 %v1142_v52, %v1141_v49  ;;  %s1515_s7 = scalar_lea.vmem %s1067_s13, 2048  ;;  %p1520_p11 = scmp.lt.s32.totalorder %s1067_s13, %s1067_s13 }
 0x304   :  { %p1516_p10 = scmp.ne.s32.totalorder %s1067_s13, %s1515_s7  ;;  %p1521_p12 = scmp.lt.s32.totalorder %s1515_s7, %s1515_s7 }
 0x305   :  { %v803_v55 = vadd.f32 %v1143_v54, %v1992_v32  ;;  %v1144_v56 = vpop.f32.mrb[42].mxu0  ;;  %1245 = vmatmul.mubr.f32.gmra.mrb[34].mxu1 %v864_v53 }
 0x306   :  { %v1145_v59 = vpop.f32.mrb[43].mxu0  ;;  %p1522_p13 = por %p1521_p12, %p1520_p11 }
 0x307   :  { %v865_v63 = vmax.f32 %v803_v55, 0.0  ;;  %v1146_v0 = vadd.f32 %v1145_v59, %v1144_v56 }
 0x308   :  { %p1523_p0 = pnand %p1522_p13, %p1516_p10 }
 0x309   :  { %v808_v1 = vadd.f32 %v1146_v0, %v1992_v32  ;;  %v1147_v2 = vpop.f32.mrb[44].mxu0  ;;  %1247 = vmatprep.mubr.f32.mxu1 %v865_v63 }
 0x30a   :  { %v1148_v58 = vpop.f32.mrb[45].mxu0 }
 0x30b   :  { %v866_v57 = vmax.f32 %v808_v1, 0.0  ;;  %v1149_v60 = vadd.f32 %v1148_v58, %v1147_v2 }
 0x30d   :  { %v813_v3 = vadd.f32 %v1149_v60, %v1992_v32  ;;  %v1150_v4 = vpop.f32.mrb[46].mxu0  ;;  %1248 = vmatmul.mubr.f32.gmra.mrb[36].mxu1 %v866_v57 }
 0x30e   :  { %v1151_v5 = vpop.f32.mrb[47].mxu0 }
 0x30f   :  { %v867_v6 = vmax.f32 %v813_v3, 0.0  ;;  %v1152_v7 = vadd.f32 %v1151_v5, %v1150_v4 }
 0x311   :  { %v818_v8 = vadd.f32 %v1152_v7, %v1992_v32  ;;  %v1153_v9 = vpop.f32.mrb[48].mxu0  ;;  %1250 = vmatprep.mubr.f32.mxu1 %v867_v6 }
 0x312   :  { %v1154_v10 = vpop.f32.mrb[49].mxu0 }
 0x313   :  { %v868_v11 = vmax.f32 %v818_v8, 0.0  ;;  %v1155_v12 = vadd.f32 %v1154_v10, %v1153_v9 }
 0x315   :  { %v823_v13 = vadd.f32 %v1155_v12, %v1992_v32  ;;  %v1156_v14 = vpop.f32.mrb[50].mxu0  ;;  %1251 = vmatmul.mubr.f32.gmra.mrb[38].mxu1 %v868_v11 }
 0x316   :  { %v1157_v15 = vpop.f32.mrb[51].mxu0 }
 0x317   :  { %v869_v16 = vmax.f32 %v823_v13, 0.0  ;;  %v1158_v17 = vadd.f32 %v1157_v15, %v1156_v14 }
 0x319   :  { %v828_v18 = vadd.f32 %v1158_v17, %v1992_v32  ;;  %v1159_v19 = vpop.f32.mrb[52].mxu0  ;;  %1253 = vmatprep.mubr.f32.mxu1 %v869_v16 }
 0x31a   :  { %v1160_v20 = vpop.f32.mrb[53].mxu0 }
 0x31b   :  { %v870_v21 = vmax.f32 %v828_v18, 0.0  ;;  %v1161_v22 = vadd.f32 %v1160_v20, %v1159_v19 }
 0x31d   :  { %v833_v23 = vadd.f32 %v1161_v22, %v1992_v32  ;;  %v1162_v24 = vpop.f32.mrb[54].mxu0  ;;  %1254 = vmatmul.mubr.f32.gmra.mrb[40].mxu1 %v870_v21 }
 0x31e   :  { %v1163_v25 = vpop.f32.mrb[55].mxu0 }
 0x31f   :  { %v871_v26 = vmax.f32 %v833_v23, 0.0  ;;  %v1164_v27 = vadd.f32 %v1163_v25, %v1162_v24 }
 0x321   :  { %v838_v28 = vadd.f32 %v1164_v27, %v1992_v32  ;;  %v1165_v29 = vpop.f32.mrb[56].mxu0  ;;  %1256 = vmatprep.mubr.f32.mxu1 %v871_v26 }
 0x322   :  { %v1166_v50 = vpop.f32.mrb[57].mxu0 }
 0x323   :  { %v872_v30 = vmax.f32 %v838_v28, 0.0  ;;  %v1167_v31 = vadd.f32 %v1166_v50, %v1165_v29 }
 0x325   :  { %v843_v51 = vadd.f32 %v1167_v31, %v1992_v32  ;;  %v1168_v33 = vpop.f32.mrb[58].mxu0  ;;  %1257 = vmatmul.mubr.f32.gmra.mrb[42].mxu1 %v872_v30 }
 0x326   :  { %v1169_v34 = vpop.f32.mrb[59].mxu0 }
 0x327   :  { %v873_v35 = vmax.f32 %v843_v51, 0.0  ;;  %v1170_v36 = vadd.f32 %v1169_v34, %v1168_v33 }
 0x329   :  { %v848_v37 = vadd.f32 %v1170_v36, %v1992_v32  ;;  %v1171_v38 = vpop.f32.mrb[60].mxu0  ;;  %1259 = vmatprep.mubr.f32.mxu1 %v873_v35 }
 0x32a   :  { %v1172_v39 = vpop.f32.mrb[61].mxu0 }
 0x32b   :  { %v874_v40 = vmax.f32 %v848_v37, 0.0  ;;  %v1173_v41 = vadd.f32 %v1172_v39, %v1171_v38 }
 0x32d   :  { %v853_v42 = vadd.f32 %v1173_v41, %v1992_v32  ;;  %v1174_v43 = vpop.f32.mrb[62].mxu0  ;;  %1260 = vmatmul.mubr.f32.gmra.mrb[44].mxu1 %v874_v40 }
 0x32e   :  { %v1175_v61 = vpop.f32.mrb[63].mxu0 }
 0x32f   :  { %v875_v44 = vmax.f32 %v853_v42, 0.0  ;;  %v1176_v62 = vadd.f32 %v1175_v61, %v1174_v43 }
 0x331   :  { %v858_v45 = vadd.f32 %v1176_v62, %v1992_v32  ;;  %1262 = vmatprep.mubr.f32.mxu1 %v875_v44 }
 0x333   :  { %v876_v46 = vmax.f32 %v858_v45, 0.0 }
 0x335   :  { %1263 = vmatmul.mubr.f32.gmra.mrb[46].mxu1 %v876_v46 }
 0x3d0   :  { %v1243_v48 = vpop.f32.mrb[32].mxu1 }
 0x3d1   :  { %v972_v49 = vadd.f32 %v1243_v48, %v1096_v47  ;;  %v966_v52 = vpop.f32.mrb[33].mxu1 }
 0x3d2   :  { %v967_v53 = vadd.f32 %v1096_v47, %v966_v52 }
 0x3d3   :  { %1046 = vst [vmem:[#allocation8 + $0x8] sm:$0xff] %v972_v49 }
 0x3d4   :  { %1045 = vst [vmem:[#allocation8] sm:$0xff] %v967_v53 }
 0x3d8   :  { %v1246_v54 = vpop.f32.mrb[34].mxu1 }
 0x3d9   :  { %v982_v55 = vadd.f32 %v1246_v54, %v1096_v47  ;;  %v976_v56 = vpop.f32.mrb[35].mxu1 }
 0x3da   :  { %v977_v59 = vadd.f32 %v1096_v47, %v976_v56 }
 0x3db   :  { %1048 = vst [vmem:[#allocation8 + $0x18] sm:$0xff] %v982_v55 }
 0x3dc   :  { %1047 = vst [vmem:[#allocation8 + $0x10] sm:$0xff] %v977_v59 }
 0x3e0   :  { %v1249_v32 = vpop.f32.mrb[36].mxu1 }
 0x3e1   :  { %v992_v63 = vadd.f32 %v1249_v32, %v1096_v47  ;;  %v986_v0 = vpop.f32.mrb[37].mxu1 }
 0x3e2   :  { %v987_v1 = vadd.f32 %v1096_v47, %v986_v0 }
 0x3e3   :  { %1050 = vst [vmem:[#allocation8 + $0x28] sm:$0xff] %v992_v63 }
 0x3e4   :  { %1049 = vst [vmem:[#allocation8 + $0x20] sm:$0xff] %v987_v1 }
 0x3e8   :  { %v1252_v2 = vpop.f32.mrb[38].mxu1 }
 0x3e9   :  { %v1002_v58 = vadd.f32 %v1252_v2, %v1096_v47  ;;  %v996_v57 = vpop.f32.mrb[39].mxu1 }
 0x3ea   :  { %v997_v60 = vadd.f32 %v1096_v47, %v996_v57 }
 0x3eb   :  { %1052 = vst [vmem:[#allocation8 + $0x38] sm:$0xff] %v1002_v58 }
 0x3ec   :  { %1051 = vst [vmem:[#allocation8 + $0x30] sm:$0xff] %v997_v60 }
 0x3f0   :  { %v1255_v3 = vpop.f32.mrb[40].mxu1 }
 0x3f1   :  { %v1012_v4 = vadd.f32 %v1255_v3, %v1096_v47  ;;  %v1006_v5 = vpop.f32.mrb[41].mxu1 }
 0x3f2   :  { %v1007_v6 = vadd.f32 %v1096_v47, %v1006_v5 }
 0x3f3   :  { %1054 = vst [vmem:[#allocation8 + $0x48] sm:$0xff] %v1012_v4 }
 0x3f4   :  { %1053 = vst [vmem:[#allocation8 + $0x40] sm:$0xff] %v1007_v6 }
 0x3f8   :  { %v1258_v7 = vpop.f32.mrb[42].mxu1 }
 0x3f9   :  { %v1022_v8 = vadd.f32 %v1258_v7, %v1096_v47  ;;  %v1016_v9 = vpop.f32.mrb[43].mxu1 }
 0x3fa   :  { %v1017_v10 = vadd.f32 %v1096_v47, %v1016_v9 }
 0x3fb   :  { %1056 = vst [vmem:[#allocation8 + $0x58] sm:$0xff] %v1022_v8 }
 0x3fc   :  { %1055 = vst [vmem:[#allocation8 + $0x50] sm:$0xff] %v1017_v10 }
 0x400   :  { %v1261_v11 = vpop.f32.mrb[44].mxu1 }
 0x401   :  { %v1032_v12 = vadd.f32 %v1261_v11, %v1096_v47  ;;  %v1026_v13 = vpop.f32.mrb[45].mxu1 }
 0x402   :  { %v1027_v14 = vadd.f32 %v1096_v47, %v1026_v13 }
 0x403   :  { %1058 = vst [vmem:[#allocation8 + $0x68] sm:$0xff] %v1032_v12 }
 0x404   :  { %1057 = vst [vmem:[#allocation8 + $0x60] sm:$0xff] %v1027_v14 }
 0x408   :  { %v1264_v15 = vpop.f32.mrb[46].mxu1 }
 0x409   :  { %v1042_v16 = vadd.f32 %v1264_v15, %v1096_v47  ;;  %v1036_v17 = vpop.f32.mrb[47].mxu1 }
 0x40a   :  { %v1037_v18 = vadd.f32 %v1096_v47, %v1036_v17 }
 0x40b   :  { %1060 = vst [vmem:[#allocation8 + $0x78] sm:$0xff] %v1042_v16 }
 0x40c   :  { %1059 = vst [vmem:[#allocation8 + $0x70] sm:$0xff] %v1037_v18 }
 0x40d   :  { %1526 = shalt.err (!%p1523_p0)
}
 0x40e   :  { %s1527_s16 = scalar_lea.hbm %s2037_s9, 2048 }
 0x40f   :  { %p1528_p1 = scmp.ne.s32.totalorder %s2037_s9, %s1527_s16  ;;  %p1531_p2 = scmp.lt.u32.totalorder %s1527_s16, %s2037_s9 }
 0x411   :  { %p1533_p3 = pnand %p1531_p2, %p1528_p1 }
 0x413   :  { %1536 = shalt.err (!%p1533_p3)
}
 0x414   :  { %1072 = dma.vmem_to_hbm [thread:$0]  %s1067_s13, 2048, %s2037_s9, [#allocation4], %s1544_s19, %s1544_s19, %s1545_s20  }
 0x415   :  { %1541 = dma.done.wait [#allocation4], 2048  }
 0x416   :  { %1542 = vsyncadd [#allocation4], 4294965248 }
 0x417   :  { %1076 = vsyncpa [#allocation3], 1 }
 0x418   :  { %1077 = vsyncpa [#allocation6], 1 }
 0x419   :  { %1078 = vsyncpa [#allocation4], 1 }

</bundles_post_ra>
